<compile_context>
chip_gen: v5e
topology: v5e:2x2
jax: 0.10.0
libtpu: 0.0.40
codegen_flags: <defaults>
</compile_context>

<pallas_src>
import functools

import jax
import jax.numpy as jnp
import numpy as np
from jax import lax
from jax.experimental import pallas as pl
from jax.experimental.pallas import tpu as pltpu

HIDDEN = 50        # hidden_units in the PyTorch script
INPUT_DIM = 1      # X_test[:, :, np.newaxis] -> feature dim 1
OUTPUT_DIM = 1

HP = 128           # lane-padded hidden size (each gate gets its own 128-lane slot)
OP = 128           # lane-padded output size


def lstm_kernel(x_ref, w_ih_ref, b_ref, w_hh_ref, w_fc_ref, b_fc_ref,
                out_ref, h_sc, c_sc, *, n_pad):
    # x_ref:    (t_blk, BT, 1)   raw inputs for this time block (batch tile BT)
    # w_ih_ref: (1, 4*HP)        input->gates weights (input_dim == 1 -> one row)
    # b_ref:    (1, 4*HP)        b_ih + b_hh, gate-slot padded
    # w_hh_ref: (HP, 4*HP)       hidden->gates weights (transposed, gate-slot padded)
    # w_fc_ref: (HP, OP)         final linear weights (transposed, padded)
    # b_fc_ref: (1, OP)
    # out_ref:  (BT, OP)
    # h_sc, c_sc: (BT, HP) f32 scratch, persistent across the (arbitrary) time axis
    t_idx = pl.program_id(1)
    t_blk = x_ref.shape[0]
    mm_dtype = w_hh_ref.dtype

    @pl.when(t_idx == 0)
    def _():
        h_sc[...] = jnp.zeros_like(h_sc)
        c_sc[...] = jnp.zeros_like(c_sc)

    def step(t, carry):
        h, c = carry
        x_t = x_ref[t]                       # (BT, 1), lane-broadcast below
        h_mm = h.astype(mm_dtype)            # bf16 LHS for the native MXU path

        def gate(k, act):
            # input projection (VPU, hidden under the serial matmul chain)
            pre = (x_t * w_ih_ref[:, k * HP:(k + 1) * HP]
                   + b_ref[:, k * HP:(k + 1) * HP]
                   + jnp.dot(h_mm, w_hh_ref[:, k * HP:(k + 1) * HP],
                             preferred_element_type=jnp.float32))
            return act(pre)                  # per-gate EUP pass overlaps next MXU push

        # PyTorch gate order: i, f, g, o  (each in its own 128-lane slot)
        i_g = gate(0, jax.nn.sigmoid)
        f_g = gate(1, jax.nn.sigmoid)
        g_g = gate(2, jnp.tanh)
        o_g = gate(3, jax.nn.sigmoid)

        c_new = f_g * c + i_g * g_g
        h_new = o_g * jnp.tanh(c_new)

        if n_pad:
            # Leading padded timesteps are no-ops: keep h = c = 0 there.
            m = ((t_idx * t_blk + t) >= n_pad).astype(jnp.float32)
            h_new = m * h_new + (1.0 - m) * h
            c_new = m * c_new + (1.0 - m) * c
        return (h_new, c_new)

    # h / c live in registers across the unrolled block; scratch is touched
    # only once at entry and once at exit.
    h, c = lax.fori_loop(0, t_blk, step, (h_sc[...], c_sc[...]), unroll=True)
    h_sc[...] = h
    c_sc[...] = c

    @pl.when(t_idx == pl.num_programs(1) - 1)
    def _():
        out_ref[...] = (jnp.dot(h, w_fc_ref[...],
                                preferred_element_type=jnp.float32)
                        + b_fc_ref[...])


def _round_up(n, m):
    return (n + m - 1) // m * m


def _cdiv(a, b):
    return -(-a // b)


def _pad_gate_cols(w_t):
    """(rows, 4*H) in torch gate order [i|f|g|o] -> (rows, 4*HP), each gate in
    its own lane-aligned HP-wide slot (zero padded)."""
    rows, four_h = w_t.shape
    h = four_h // 4
    out = jnp.zeros((rows, 4 * HP), w_t.dtype)
    for k in range(4):
        out = out.at[:, k * HP:k * HP + h].set(w_t[:, k * h:(k + 1) * h])
    return out


def lstm_model_forward(x, params, *, matmul_dtype=jnp.bfloat16, max_t_blk=32):
    """x: (B, T, D) float32, PyTorch batch_first convention. Returns (B, OUTPUT_DIM)."""
    w_ih, w_hh, b_ih, b_hh, w_fc, b_fc = params
    B, T, D = x.shape
    assert D == INPUT_DIM

    # ---- pack / pad parameters (tiny plain-JAX glue) -----------------------
    w_ih_row = _pad_gate_cols(w_ih.T).astype(jnp.float32)          # (1, 4*HP)
    b_row = _pad_gate_cols((b_ih + b_hh)[None, :]).astype(jnp.float32)

    w_hh_p = jnp.zeros((HP, 4 * HP), jnp.float32)
    w_hh_p = w_hh_p.at[:HIDDEN, :].set(_pad_gate_cols(w_hh.T))
    w_hh_p = w_hh_p.astype(matmul_dtype)                           # bf16 by default

    w_fc_p = jnp.zeros((HP, OP), jnp.float32).at[:HIDDEN, :OUTPUT_DIM].set(w_fc.T)
    b_fc_p = jnp.zeros((1, OP), jnp.float32).at[0, :OUTPUT_DIM].set(b_fc)

    # ---- batch tiling -------------------------------------------------------
    if B <= 15:
        b_tile = max(8, _round_up(B, 8))            # single tile, full sublane group
    else:
        # >=2 tiles so the "parallel" batch axis feeds both v7x TensorCores.
        b_tile = min(128, _round_up(_cdiv(B, 2), 8))
    n_b_tiles = _cdiv(B, b_tile)
    BP = n_b_tiles * b_tile

    # ---- time tiling: pad up front, mask the padded no-op steps in-kernel ---
    t_blk = min(max_t_blk, T)
    n_t_blocks = _cdiv(T, t_blk)
    T_pad = n_t_blocks * t_blk
    n_pad = T_pad - T

    # Stream the RAW input (time-major, batch-padded); 4 B per (t, b) element.
    x_tm = jnp.transpose(x, (1, 0, 2))                             # (T, B, 1)
    x_p = jnp.zeros((T_pad, BP, 1), jnp.float32).at[n_pad:, :B, :].set(x_tm)

    # ---- pallas call ---------------------------------------------------------
    w_itemsize = jnp.dtype(matmul_dtype).itemsize
    vmem_bytes = int(
        2 * t_blk * b_tile * 128 * 4          # double-buffered x blocks (lane-padded)
        + 2 * HP * 4 * HP * w_itemsize        # W_hh
        + 2 * 2 * 8 * 4 * HP * 4              # w_ih_row + b_row (sublane-padded)
        + 2 * (HP * OP + 8 * OP) * 4          # FC weights / bias
        + 2 * b_tile * OP * 4                 # output block
        + 2 * b_tile * HP * 4                 # h / c scratch
        + (4 << 20))                          # headroom
    vmem_bytes = max(vmem_bytes, 8 * 1024 * 1024)

    cost = pl.CostEstimate(
        flops=int(T_pad * BP * (2 * HP * 4 * HP + 12 * 4 * HP) + 2 * BP * HP * OP),
        transcendentals=int(T_pad * BP * 5 * HP),
        bytes_accessed=int(x_p.size * 4
                           + w_hh_p.size * w_itemsize
                           + (w_ih_row.size + b_row.size + w_fc_p.size
                              + b_fc_p.size + BP * OP) * 4),
    )

    out_p = pl.pallas_call(
        functools.partial(lstm_kernel, n_pad=n_pad),
        out_shape=jax.ShapeDtypeStruct((BP, OP), jnp.float32),
        grid_spec=pltpu.PrefetchScalarGridSpec(
            num_scalar_prefetch=0,
            grid=(n_b_tiles, n_t_blocks),
            in_specs=[
                pl.BlockSpec((t_blk, b_tile, 1), lambda bi, ti: (ti, bi, 0)),
                pl.BlockSpec((1, 4 * HP), lambda bi, ti: (0, 0)),
                pl.BlockSpec((1, 4 * HP), lambda bi, ti: (0, 0)),
                pl.BlockSpec((HP, 4 * HP), lambda bi, ti: (0, 0)),
                pl.BlockSpec((HP, OP), lambda bi, ti: (0, 0)),
                pl.BlockSpec((1, OP), lambda bi, ti: (0, 0)),
            ],
            out_specs=pl.BlockSpec((b_tile, OP), lambda bi, ti: (bi, 0)),
            scratch_shapes=[pltpu.VMEM((b_tile, HP), jnp.float32),
                            pltpu.VMEM((b_tile, HP), jnp.float32)],
        ),
        compiler_params=pltpu.CompilerParams(
            dimension_semantics=("parallel", "arbitrary"),
            vmem_limit_bytes=vmem_bytes),
        cost_estimate=cost,
    )(x_p, w_ih_row, b_row, w_hh_p, w_fc_p, b_fc_p)

    return out_p[:B, :OUTPUT_DIM]


def reference_forward(x, params):
    """Plain-JAX reference mirroring torch nn.LSTM + nn.Linear semantics."""
    w_ih, w_hh, b_ih, b_hh, w_fc, b_fc = params
    B, T, _ = x.shape
    H = HIDDEN
    h = jnp.zeros((B, H), jnp.float32)
    c = jnp.zeros((B, H), jnp.float32)
    for t in range(T):
        gates = x[:, t, :] @ w_ih.T + h @ w_hh.T + b_ih + b_hh
        i = jax.nn.sigmoid(gates[:, 0:H])
        f = jax.nn.sigmoid(gates[:, H:2 * H])
        g = jnp.tanh(gates[:, 2 * H:3 * H])
        o = jax.nn.sigmoid(gates[:, 3 * H:4 * H])
        c = f * c + i * g
        h = o * jnp.tanh(c)
    return h @ w_fc.T + b_fc


def init_params(key):
    """Deterministic init matching PyTorch shapes: uniform(-1/sqrt(H), 1/sqrt(H))."""
    k = 1.0 / np.sqrt(HIDDEN)
    ks = jax.random.split(key, 6)
    w_ih = jax.random.uniform(ks[0], (4 * HIDDEN, INPUT_DIM), jnp.float32, -k, k)
    w_hh = jax.random.uniform(ks[1], (4 * HIDDEN, HIDDEN), jnp.float32, -k, k)
    b_ih = jax.random.uniform(ks[2], (4 * HIDDEN,), jnp.float32, -k, k)
    b_hh = jax.random.uniform(ks[3], (4 * HIDDEN,), jnp.float32, -k, k)
    w_fc = jax.random.uniform(ks[4], (OUTPUT_DIM, HIDDEN), jnp.float32, -k, k)
    b_fc = jax.random.uniform(ks[5], (OUTPUT_DIM,), jnp.float32, -k, k)
    return (w_ih, w_hh, b_ih, b_hh, w_fc, b_fc)


if __name__ == "__main__":
    key = jax.random.PRNGKey(0)
    k_param, k_x1, k_x2 = jax.random.split(key, 3)
    params = init_params(k_param)

    # --- small shape matching the PyTorch usage (B=2, T=8, D=1) -------------
    x1 = jax.random.normal(k_x1, (2, 8, INPUT_DIM), jnp.float32)
    ref1 = reference_forward(x1, params)

    # default bf16-MXU path (f32 accumulation / state)
    out_bf16 = jax.block_until_ready(lstm_model_forward(x1, params))
    np.testing.assert_allclose(np.asarray(out_bf16), np.asarray(ref1),
                               rtol=2e-2, atol=2e-2)

    # f32 matmul path (exact PyTorch semantics)
    out_f32 = jax.block_until_ready(
        lstm_model_forward(x1, params, matmul_dtype=jnp.float32))
    np.testing.assert_allclose(np.asarray(out_f32), np.asarray(ref1),
                               rtol=1e-4, atol=1e-4)

    # --- exercise multi batch-tile + multi time-block + time padding --------
    x2 = jax.random.normal(k_x2, (20, 11, INPUT_DIM), jnp.float32)
    ref2 = reference_forward(x2, params)
    out2 = jax.block_until_ready(
        lstm_model_forward(x2, params, matmul_dtype=jnp.float32, max_t_blk=8))
    np.testing.assert_allclose(np.asarray(out2), np.asarray(ref2),
                               rtol=1e-4, atol=1e-4)

    print("KERNEL_OK")
</pallas_src>

<mosaic_0001>
module attributes {stable_mosaic.version = 11 : i64} {
  func.func @lstm_kernel(%arg0: i32, %arg1: i32, %arg2: memref<8x8x1xf32, #tpu.memory_space<vmem>>, %arg3: memref<1x512xf32, #tpu.memory_space<vmem>>, %arg4: memref<1x512xf32, #tpu.memory_space<vmem>>, %arg5: memref<128x512xbf16, #tpu.memory_space<vmem>>, %arg6: memref<128x128xf32, #tpu.memory_space<vmem>>, %arg7: memref<1x128xf32, #tpu.memory_space<vmem>>, %arg8: memref<8x128xf32, #tpu.memory_space<vmem>>, %arg9: memref<8x128xf32, #tpu.memory_space<vmem>>, %arg10: memref<8x128xf32, #tpu.memory_space<vmem>>) attributes {dimension_semantics = [#tpu.dimension_semantics<parallel>, #tpu.dimension_semantics<arbitrary>], iteration_bounds = array<i64: 1, 1>, scalar_prefetch = 0 : i64, scratch_operands = 2 : i64, tpu.core_type = #tpu.core_type<tc>, window_params = [{transform_indices = @transform_0, window_bounds = array<i64: 8, 8, 1>}, {pipeline_mode = #tpu.pipeline_mode<synchronous>, transform_indices = @transform_1, window_bounds = array<i64: 1, 512>}, {pipeline_mode = #tpu.pipeline_mode<synchronous>, transform_indices = @transform_2, window_bounds = array<i64: 1, 512>}, {pipeline_mode = #tpu.pipeline_mode<synchronous>, transform_indices = @transform_3, window_bounds = array<i64: 128, 512>}, {pipeline_mode = #tpu.pipeline_mode<synchronous>, transform_indices = @transform_4, window_bounds = array<i64: 128, 128>}, {pipeline_mode = #tpu.pipeline_mode<synchronous>, transform_indices = @transform_5, window_bounds = array<i64: 1, 128>}, {transform_indices = @transform_6, window_bounds = array<i64: 8, 128>}]} {
    %c0_i32 = arith.constant 0 : i32
    %0 = arith.cmpi eq, %arg1, %c0_i32 : i32
    %1 = arith.extui %0 : i1 to i32
    %c0_i32_0 = arith.constant 0 : i32
    %2 = arith.cmpi ne, %1, %c0_i32_0 : i32
    scf.if %2 {
      %cst_271 = arith.constant 0.000000e+00 : f32
      %530 = vector.broadcast %cst_271 : f32 to vector<8x128xf32>
      %c0_272 = arith.constant 0 : index
      %c0_273 = arith.constant 0 : index
      %531 = vector.load %arg9[%c0_272, %c0_273] : memref<8x128xf32, #tpu.memory_space<vmem>>, vector<8x128xf32>
      tpu.vector_store %arg9[%c0_272, %c0_273], %530 {strides = array<i32>} : memref<8x128xf32, #tpu.memory_space<vmem>>, vector<8x128xf32>,
      %cst_274 = arith.constant 0.000000e+00 : f32
      %532 = vector.broadcast %cst_274 : f32 to vector<8x128xf32>
      %c0_275 = arith.constant 0 : index
      %c0_276 = arith.constant 0 : index
      %533 = vector.load %arg10[%c0_275, %c0_276] : memref<8x128xf32, #tpu.memory_space<vmem>>, vector<8x128xf32>
      tpu.vector_store %arg10[%c0_275, %c0_276], %532 {strides = array<i32>} : memref<8x128xf32, #tpu.memory_space<vmem>>, vector<8x128xf32>,
    } else {
    }
    %c0 = arith.constant 0 : index
    %c0_1 = arith.constant 0 : index
    %3 = vector.load %arg9[%c0, %c0_1] : memref<8x128xf32, #tpu.memory_space<vmem>>, vector<8x128xf32>
    %c0_2 = arith.constant 0 : index
    %c0_3 = arith.constant 0 : index
    %4 = vector.load %arg10[%c0_2, %c0_3] : memref<8x128xf32, #tpu.memory_space<vmem>>, vector<8x128xf32>
    %c0_i32_4 = arith.constant 0 : i32
    %5 = arith.index_cast %c0_i32_4 : i32 to index
    %c0_5 = arith.constant 0 : index
    %c0_6 = arith.constant 0 : index
    %6 = vector.load %arg2[%5, %c0_5, %c0_6] : memref<8x8x1xf32, #tpu.memory_space<vmem>>, vector<1x8x1xf32>
    %7 = vector.shape_cast %6 : vector<1x8x1xf32> to vector<8x1xf32>
    %8 = arith.truncf %3 : vector<8x128xf32> to vector<8x128xbf16>
    %c0_7 = arith.constant 0 : index
    %c0_8 = arith.constant 0 : index
    %9 = vector.load %arg3[%c0_7, %c0_8] : memref<1x512xf32, #tpu.memory_space<vmem>>, vector<1x128xf32>
    %10 = vector.broadcast %7 : vector<8x1xf32> to vector<8x128xf32>
    %11 = vector.broadcast %9 : vector<1x128xf32> to vector<8x128xf32>
    %12 = arith.mulf %10, %11 : vector<8x128xf32>
    %c0_9 = arith.constant 0 : index
    %c0_10 = arith.constant 0 : index
    %13 = vector.load %arg4[%c0_9, %c0_10] : memref<1x512xf32, #tpu.memory_space<vmem>>, vector<1x128xf32>
    %14 = vector.broadcast %13 : vector<1x128xf32> to vector<8x128xf32>
    %15 = arith.addf %12, %14 : vector<8x128xf32>
    %c0_11 = arith.constant 0 : index
    %c0_12 = arith.constant 0 : index
    %16 = vector.load %arg5[%c0_11, %c0_12] : memref<128x512xbf16, #tpu.memory_space<vmem>>, vector<128x128xbf16>
    %cst = arith.constant dense<0.000000e+00> : vector<8x128xf32>
    %17 = tpu.matmul %8, %16, %cst {dimension_numbers = #tpu.dot_dimension_numbers<[1], [0], [0], [1], [0, 0, 1, 1], [], []>} : vector<8x128xbf16>, vector<128x128xbf16>, vector<8x128xf32> -> vector<8x128xf32>
    %18 = arith.addf %15, %17 : vector<8x128xf32>
    %19 = arith.negf %18 : vector<8x128xf32>
    %20 = math.exp %19 : vector<8x128xf32>
    %cst_13 = arith.constant 1.000000e+00 : f32
    %21 = vector.broadcast %cst_13 : f32 to vector<8x128xf32>
    %22 = arith.addf %21, %20 : vector<8x128xf32>
    %23 = arith.divf %21, %22 : vector<8x128xf32>
    %c0_14 = arith.constant 0 : index
    %c128 = arith.constant 128 : index
    %24 = vector.load %arg3[%c0_14, %c128] : memref<1x512xf32, #tpu.memory_space<vmem>>, vector<1x128xf32>
    %25 = vector.broadcast %7 : vector<8x1xf32> to vector<8x128xf32>
    %26 = vector.broadcast %24 : vector<1x128xf32> to vector<8x128xf32>
    %27 = arith.mulf %25, %26 : vector<8x128xf32>
    %c0_15 = arith.constant 0 : index
    %c128_16 = arith.constant 128 : index
    %28 = vector.load %arg4[%c0_15, %c128_16] : memref<1x512xf32, #tpu.memory_space<vmem>>, vector<1x128xf32>
    %29 = vector.broadcast %28 : vector<1x128xf32> to vector<8x128xf32>
    %30 = arith.addf %27, %29 : vector<8x128xf32>
    %c0_17 = arith.constant 0 : index
    %c128_18 = arith.constant 128 : index
    %31 = vector.load %arg5[%c0_17, %c128_18] : memref<128x512xbf16, #tpu.memory_space<vmem>>, vector<128x128xbf16>
    %cst_19 = arith.constant dense<0.000000e+00> : vector<8x128xf32>
    %32 = tpu.matmul %8, %31, %cst_19 {dimension_numbers = #tpu.dot_dimension_numbers<[1], [0], [0], [1], [0, 0, 1, 1], [], []>} : vector<8x128xbf16>, vector<128x128xbf16>, vector<8x128xf32> -> vector<8x128xf32>
    %33 = arith.addf %30, %32 : vector<8x128xf32>
    %34 = arith.negf %33 : vector<8x128xf32>
    %35 = math.exp %34 : vector<8x128xf32>
    %cst_20 = arith.constant 1.000000e+00 : f32
    %36 = vector.broadcast %cst_20 : f32 to vector<8x128xf32>
    %37 = arith.addf %36, %35 : vector<8x128xf32>
    %38 = arith.divf %36, %37 : vector<8x128xf32>
    %c0_21 = arith.constant 0 : index
    %c256 = arith.constant 256 : index
    %39 = vector.load %arg3[%c0_21, %c256] : memref<1x512xf32, #tpu.memory_space<vmem>>, vector<1x128xf32>
    %40 = vector.broadcast %7 : vector<8x1xf32> to vector<8x128xf32>
    %41 = vector.broadcast %39 : vector<1x128xf32> to vector<8x128xf32>
    %42 = arith.mulf %40, %41 : vector<8x128xf32>
    %c0_22 = arith.constant 0 : index
    %c256_23 = arith.constant 256 : index
    %43 = vector.load %arg4[%c0_22, %c256_23] : memref<1x512xf32, #tpu.memory_space<vmem>>, vector<1x128xf32>
    %44 = vector.broadcast %43 : vector<1x128xf32> to vector<8x128xf32>
    %45 = arith.addf %42, %44 : vector<8x128xf32>
    %c0_24 = arith.constant 0 : index
    %c256_25 = arith.constant 256 : index
    %46 = vector.load %arg5[%c0_24, %c256_25] : memref<128x512xbf16, #tpu.memory_space<vmem>>, vector<128x128xbf16>
    %cst_26 = arith.constant dense<0.000000e+00> : vector<8x128xf32>
    %47 = tpu.matmul %8, %46, %cst_26 {dimension_numbers = #tpu.dot_dimension_numbers<[1], [0], [0], [1], [0, 0, 1, 1], [], []>} : vector<8x128xbf16>, vector<128x128xbf16>, vector<8x128xf32> -> vector<8x128xf32>
    %48 = arith.addf %45, %47 : vector<8x128xf32>
    %49 = math.tanh %48 : vector<8x128xf32>
    %c0_27 = arith.constant 0 : index
    %c384 = arith.constant 384 : index
    %50 = vector.load %arg3[%c0_27, %c384] : memref<1x512xf32, #tpu.memory_space<vmem>>, vector<1x128xf32>
    %51 = vector.broadcast %7 : vector<8x1xf32> to vector<8x128xf32>
    %52 = vector.broadcast %50 : vector<1x128xf32> to vector<8x128xf32>
    %53 = arith.mulf %51, %52 : vector<8x128xf32>
    %c0_28 = arith.constant 0 : index
    %c384_29 = arith.constant 384 : index
    %54 = vector.load %arg4[%c0_28, %c384_29] : memref<1x512xf32, #tpu.memory_space<vmem>>, vector<1x128xf32>
    %55 = vector.broadcast %54 : vector<1x128xf32> to vector<8x128xf32>
    %56 = arith.addf %53, %55 : vector<8x128xf32>
    %c0_30 = arith.constant 0 : index
    %c384_31 = arith.constant 384 : index
    %57 = vector.load %arg5[%c0_30, %c384_31] : memref<128x512xbf16, #tpu.memory_space<vmem>>, vector<128x128xbf16>
    %cst_32 = arith.constant dense<0.000000e+00> : vector<8x128xf32>
    %58 = tpu.matmul %8, %57, %cst_32 {dimension_numbers = #tpu.dot_dimension_numbers<[1], [0], [0], [1], [0, 0, 1, 1], [], []>} : vector<8x128xbf16>, vector<128x128xbf16>, vector<8x128xf32> -> vector<8x128xf32>
    %59 = arith.addf %56, %58 : vector<8x128xf32>
    %60 = arith.negf %59 : vector<8x128xf32>
    %61 = math.exp %60 : vector<8x128xf32>
    %cst_33 = arith.constant 1.000000e+00 : f32
    %62 = vector.broadcast %cst_33 : f32 to vector<8x128xf32>
    %63 = arith.addf %62, %61 : vector<8x128xf32>
    %64 = arith.divf %62, %63 : vector<8x128xf32>
    %65 = arith.mulf %38, %4 : vector<8x128xf32>
    %66 = arith.mulf %23, %49 : vector<8x128xf32>
    %67 = arith.addf %65, %66 : vector<8x128xf32>
    %68 = math.tanh %67 : vector<8x128xf32>
    %69 = arith.mulf %64, %68 : vector<8x128xf32>
    %c1_i32 = arith.constant 1 : i32
    %70 = arith.index_cast %c1_i32 : i32 to index
    %c0_34 = arith.constant 0 : index
    %c0_35 = arith.constant 0 : index
    %71 = vector.load %arg2[%70, %c0_34, %c0_35] : memref<8x8x1xf32, #tpu.memory_space<vmem>>, vector<1x8x1xf32>
    %72 = vector.shape_cast %71 : vector<1x8x1xf32> to vector<8x1xf32>
    %73 = arith.truncf %69 : vector<8x128xf32> to vector<8x128xbf16>
    %c0_36 = arith.constant 0 : index
    %c0_37 = arith.constant 0 : index
    %74 = vector.load %arg3[%c0_36, %c0_37] : memref<1x512xf32, #tpu.memory_space<vmem>>, vector<1x128xf32>
    %75 = vector.broadcast %72 : vector<8x1xf32> to vector<8x128xf32>
    %76 = vector.broadcast %74 : vector<1x128xf32> to vector<8x128xf32>
    %77 = arith.mulf %75, %76 : vector<8x128xf32>
    %c0_38 = arith.constant 0 : index
    %c0_39 = arith.constant 0 : index
    %78 = vector.load %arg4[%c0_38, %c0_39] : memref<1x512xf32, #tpu.memory_space<vmem>>, vector<1x128xf32>
    %79 = vector.broadcast %78 : vector<1x128xf32> to vector<8x128xf32>
    %80 = arith.addf %77, %79 : vector<8x128xf32>
    %c0_40 = arith.constant 0 : index
    %c0_41 = arith.constant 0 : index
    %81 = vector.load %arg5[%c0_40, %c0_41] : memref<128x512xbf16, #tpu.memory_space<vmem>>, vector<128x128xbf16>
    %cst_42 = arith.constant dense<0.000000e+00> : vector<8x128xf32>
    %82 = tpu.matmul %73, %81, %cst_42 {dimension_numbers = #tpu.dot_dimension_numbers<[1], [0], [0], [1], [0, 0, 1, 1], [], []>} : vector<8x128xbf16>, vector<128x128xbf16>, vector<8x128xf32> -> vector<8x128xf32>
    %83 = arith.addf %80, %82 : vector<8x128xf32>
    %84 = arith.negf %83 : vector<8x128xf32>
    %85 = math.exp %84 : vector<8x128xf32>
    %cst_43 = arith.constant 1.000000e+00 : f32
    %86 = vector.broadcast %cst_43 : f32 to vector<8x128xf32>
    %87 = arith.addf %86, %85 : vector<8x128xf32>
    %88 = arith.divf %86, %87 : vector<8x128xf32>
    %c0_44 = arith.constant 0 : index
    %c128_45 = arith.constant 128 : index
    %89 = vector.load %arg3[%c0_44, %c128_45] : memref<1x512xf32, #tpu.memory_space<vmem>>, vector<1x128xf32>
    %90 = vector.broadcast %72 : vector<8x1xf32> to vector<8x128xf32>
    %91 = vector.broadcast %89 : vector<1x128xf32> to vector<8x128xf32>
    %92 = arith.mulf %90, %91 : vector<8x128xf32>
    %c0_46 = arith.constant 0 : index
    %c128_47 = arith.constant 128 : index
    %93 = vector.load %arg4[%c0_46, %c128_47] : memref<1x512xf32, #tpu.memory_space<vmem>>, vector<1x128xf32>
    %94 = vector.broadcast %93 : vector<1x128xf32> to vector<8x128xf32>
    %95 = arith.addf %92, %94 : vector<8x128xf32>
    %c0_48 = arith.constant 0 : index
    %c128_49 = arith.constant 128 : index
    %96 = vector.load %arg5[%c0_48, %c128_49] : memref<128x512xbf16, #tpu.memory_space<vmem>>, vector<128x128xbf16>
    %cst_50 = arith.constant dense<0.000000e+00> : vector<8x128xf32>
    %97 = tpu.matmul %73, %96, %cst_50 {dimension_numbers = #tpu.dot_dimension_numbers<[1], [0], [0], [1], [0, 0, 1, 1], [], []>} : vector<8x128xbf16>, vector<128x128xbf16>, vector<8x128xf32> -> vector<8x128xf32>
    %98 = arith.addf %95, %97 : vector<8x128xf32>
    %99 = arith.negf %98 : vector<8x128xf32>
    %100 = math.exp %99 : vector<8x128xf32>
    %cst_51 = arith.constant 1.000000e+00 : f32
    %101 = vector.broadcast %cst_51 : f32 to vector<8x128xf32>
    %102 = arith.addf %101, %100 : vector<8x128xf32>
    %103 = arith.divf %101, %102 : vector<8x128xf32>
    %c0_52 = arith.constant 0 : index
    %c256_53 = arith.constant 256 : index
    %104 = vector.load %arg3[%c0_52, %c256_53] : memref<1x512xf32, #tpu.memory_space<vmem>>, vector<1x128xf32>
    %105 = vector.broadcast %72 : vector<8x1xf32> to vector<8x128xf32>
    %106 = vector.broadcast %104 : vector<1x128xf32> to vector<8x128xf32>
    %107 = arith.mulf %105, %106 : vector<8x128xf32>
    %c0_54 = arith.constant 0 : index
    %c256_55 = arith.constant 256 : index
    %108 = vector.load %arg4[%c0_54, %c256_55] : memref<1x512xf32, #tpu.memory_space<vmem>>, vector<1x128xf32>
    %109 = vector.broadcast %108 : vector<1x128xf32> to vector<8x128xf32>
    %110 = arith.addf %107, %109 : vector<8x128xf32>
    %c0_56 = arith.constant 0 : index
    %c256_57 = arith.constant 256 : index
    %111 = vector.load %arg5[%c0_56, %c256_57] : memref<128x512xbf16, #tpu.memory_space<vmem>>, vector<128x128xbf16>
    %cst_58 = arith.constant dense<0.000000e+00> : vector<8x128xf32>
    %112 = tpu.matmul %73, %111, %cst_58 {dimension_numbers = #tpu.dot_dimension_numbers<[1], [0], [0], [1], [0, 0, 1, 1], [], []>} : vector<8x128xbf16>, vector<128x128xbf16>, vector<8x128xf32> -> vector<8x128xf32>
    %113 = arith.addf %110, %112 : vector<8x128xf32>
    %114 = math.tanh %113 : vector<8x128xf32>
    %c0_59 = arith.constant 0 : index
    %c384_60 = arith.constant 384 : index
    %115 = vector.load %arg3[%c0_59, %c384_60] : memref<1x512xf32, #tpu.memory_space<vmem>>, vector<1x128xf32>
    %116 = vector.broadcast %72 : vector<8x1xf32> to vector<8x128xf32>
    %117 = vector.broadcast %115 : vector<1x128xf32> to vector<8x128xf32>
    %118 = arith.mulf %116, %117 : vector<8x128xf32>
    %c0_61 = arith.constant 0 : index
    %c384_62 = arith.constant 384 : index
    %119 = vector.load %arg4[%c0_61, %c384_62] : memref<1x512xf32, #tpu.memory_space<vmem>>, vector<1x128xf32>
    %120 = vector.broadcast %119 : vector<1x128xf32> to vector<8x128xf32>
    %121 = arith.addf %118, %120 : vector<8x128xf32>
    %c0_63 = arith.constant 0 : index
    %c384_64 = arith.constant 384 : index
    %122 = vector.load %arg5[%c0_63, %c384_64] : memref<128x512xbf16, #tpu.memory_space<vmem>>, vector<128x128xbf16>
    %cst_65 = arith.constant dense<0.000000e+00> : vector<8x128xf32>
    %123 = tpu.matmul %73, %122, %cst_65 {dimension_numbers = #tpu.dot_dimension_numbers<[1], [0], [0], [1], [0, 0, 1, 1], [], []>} : vector<8x128xbf16>, vector<128x128xbf16>, vector<8x128xf32> -> vector<8x128xf32>
    %124 = arith.addf %121, %123 : vector<8x128xf32>
    %125 = arith.negf %124 : vector<8x128xf32>
    %126 = math.exp %125 : vector<8x128xf32>
    %cst_66 = arith.constant 1.000000e+00 : f32
    %127 = vector.broadcast %cst_66 : f32 to vector<8x128xf32>
    %128 = arith.addf %127, %126 : vector<8x128xf32>
    %129 = arith.divf %127, %128 : vector<8x128xf32>
    %130 = arith.mulf %103, %67 : vector<8x128xf32>
    %131 = arith.mulf %88, %114 : vector<8x128xf32>
    %132 = arith.addf %130, %131 : vector<8x128xf32>
    %133 = math.tanh %132 : vector<8x128xf32>
    %134 = arith.mulf %129, %133 : vector<8x128xf32>
    %c2_i32 = arith.constant 2 : i32
    %135 = arith.index_cast %c2_i32 : i32 to index
    %c0_67 = arith.constant 0 : index
    %c0_68 = arith.constant 0 : index
    %136 = vector.load %arg2[%135, %c0_67, %c0_68] : memref<8x8x1xf32, #tpu.memory_space<vmem>>, vector<1x8x1xf32>
    %137 = vector.shape_cast %136 : vector<1x8x1xf32> to vector<8x1xf32>
    %138 = arith.truncf %134 : vector<8x128xf32> to vector<8x128xbf16>
    %c0_69 = arith.constant 0 : index
    %c0_70 = arith.constant 0 : index
    %139 = vector.load %arg3[%c0_69, %c0_70] : memref<1x512xf32, #tpu.memory_space<vmem>>, vector<1x128xf32>
    %140 = vector.broadcast %137 : vector<8x1xf32> to vector<8x128xf32>
    %141 = vector.broadcast %139 : vector<1x128xf32> to vector<8x128xf32>
    %142 = arith.mulf %140, %141 : vector<8x128xf32>
    %c0_71 = arith.constant 0 : index
    %c0_72 = arith.constant 0 : index
    %143 = vector.load %arg4[%c0_71, %c0_72] : memref<1x512xf32, #tpu.memory_space<vmem>>, vector<1x128xf32>
    %144 = vector.broadcast %143 : vector<1x128xf32> to vector<8x128xf32>
    %145 = arith.addf %142, %144 : vector<8x128xf32>
    %c0_73 = arith.constant 0 : index
    %c0_74 = arith.constant 0 : index
    %146 = vector.load %arg5[%c0_73, %c0_74] : memref<128x512xbf16, #tpu.memory_space<vmem>>, vector<128x128xbf16>
    %cst_75 = arith.constant dense<0.000000e+00> : vector<8x128xf32>
    %147 = tpu.matmul %138, %146, %cst_75 {dimension_numbers = #tpu.dot_dimension_numbers<[1], [0], [0], [1], [0, 0, 1, 1], [], []>} : vector<8x128xbf16>, vector<128x128xbf16>, vector<8x128xf32> -> vector<8x128xf32>
    %148 = arith.addf %145, %147 : vector<8x128xf32>
    %149 = arith.negf %148 : vector<8x128xf32>
    %150 = math.exp %149 : vector<8x128xf32>
    %cst_76 = arith.constant 1.000000e+00 : f32
    %151 = vector.broadcast %cst_76 : f32 to vector<8x128xf32>
    %152 = arith.addf %151, %150 : vector<8x128xf32>
    %153 = arith.divf %151, %152 : vector<8x128xf32>
    %c0_77 = arith.constant 0 : index
    %c128_78 = arith.constant 128 : index
    %154 = vector.load %arg3[%c0_77, %c128_78] : memref<1x512xf32, #tpu.memory_space<vmem>>, vector<1x128xf32>
    %155 = vector.broadcast %137 : vector<8x1xf32> to vector<8x128xf32>
    %156 = vector.broadcast %154 : vector<1x128xf32> to vector<8x128xf32>
    %157 = arith.mulf %155, %156 : vector<8x128xf32>
    %c0_79 = arith.constant 0 : index
    %c128_80 = arith.constant 128 : index
    %158 = vector.load %arg4[%c0_79, %c128_80] : memref<1x512xf32, #tpu.memory_space<vmem>>, vector<1x128xf32>
    %159 = vector.broadcast %158 : vector<1x128xf32> to vector<8x128xf32>
    %160 = arith.addf %157, %159 : vector<8x128xf32>
    %c0_81 = arith.constant 0 : index
    %c128_82 = arith.constant 128 : index
    %161 = vector.load %arg5[%c0_81, %c128_82] : memref<128x512xbf16, #tpu.memory_space<vmem>>, vector<128x128xbf16>
    %cst_83 = arith.constant dense<0.000000e+00> : vector<8x128xf32>
    %162 = tpu.matmul %138, %161, %cst_83 {dimension_numbers = #tpu.dot_dimension_numbers<[1], [0], [0], [1], [0, 0, 1, 1], [], []>} : vector<8x128xbf16>, vector<128x128xbf16>, vector<8x128xf32> -> vector<8x128xf32>
    %163 = arith.addf %160, %162 : vector<8x128xf32>
    %164 = arith.negf %163 : vector<8x128xf32>
    %165 = math.exp %164 : vector<8x128xf32>
    %cst_84 = arith.constant 1.000000e+00 : f32
    %166 = vector.broadcast %cst_84 : f32 to vector<8x128xf32>
    %167 = arith.addf %166, %165 : vector<8x128xf32>
    %168 = arith.divf %166, %167 : vector<8x128xf32>
    %c0_85 = arith.constant 0 : index
    %c256_86 = arith.constant 256 : index
    %169 = vector.load %arg3[%c0_85, %c256_86] : memref<1x512xf32, #tpu.memory_space<vmem>>, vector<1x128xf32>
    %170 = vector.broadcast %137 : vector<8x1xf32> to vector<8x128xf32>
    %171 = vector.broadcast %169 : vector<1x128xf32> to vector<8x128xf32>
    %172 = arith.mulf %170, %171 : vector<8x128xf32>
    %c0_87 = arith.constant 0 : index
    %c256_88 = arith.constant 256 : index
    %173 = vector.load %arg4[%c0_87, %c256_88] : memref<1x512xf32, #tpu.memory_space<vmem>>, vector<1x128xf32>
    %174 = vector.broadcast %173 : vector<1x128xf32> to vector<8x128xf32>
    %175 = arith.addf %172, %174 : vector<8x128xf32>
    %c0_89 = arith.constant 0 : index
    %c256_90 = arith.constant 256 : index
    %176 = vector.load %arg5[%c0_89, %c256_90] : memref<128x512xbf16, #tpu.memory_space<vmem>>, vector<128x128xbf16>
    %cst_91 = arith.constant dense<0.000000e+00> : vector<8x128xf32>
    %177 = tpu.matmul %138, %176, %cst_91 {dimension_numbers = #tpu.dot_dimension_numbers<[1], [0], [0], [1], [0, 0, 1, 1], [], []>} : vector<8x128xbf16>, vector<128x128xbf16>, vector<8x128xf32> -> vector<8x128xf32>
    %178 = arith.addf %175, %177 : vector<8x128xf32>
    %179 = math.tanh %178 : vector<8x128xf32>
    %c0_92 = arith.constant 0 : index
    %c384_93 = arith.constant 384 : index
    %180 = vector.load %arg3[%c0_92, %c384_93] : memref<1x512xf32, #tpu.memory_space<vmem>>, vector<1x128xf32>
    %181 = vector.broadcast %137 : vector<8x1xf32> to vector<8x128xf32>
    %182 = vector.broadcast %180 : vector<1x128xf32> to vector<8x128xf32>
    %183 = arith.mulf %181, %182 : vector<8x128xf32>
    %c0_94 = arith.constant 0 : index
    %c384_95 = arith.constant 384 : index
    %184 = vector.load %arg4[%c0_94, %c384_95] : memref<1x512xf32, #tpu.memory_space<vmem>>, vector<1x128xf32>
    %185 = vector.broadcast %184 : vector<1x128xf32> to vector<8x128xf32>
    %186 = arith.addf %183, %185 : vector<8x128xf32>
    %c0_96 = arith.constant 0 : index
    %c384_97 = arith.constant 384 : index
    %187 = vector.load %arg5[%c0_96, %c384_97] : memref<128x512xbf16, #tpu.memory_space<vmem>>, vector<128x128xbf16>
    %cst_98 = arith.constant dense<0.000000e+00> : vector<8x128xf32>
    %188 = tpu.matmul %138, %187, %cst_98 {dimension_numbers = #tpu.dot_dimension_numbers<[1], [0], [0], [1], [0, 0, 1, 1], [], []>} : vector<8x128xbf16>, vector<128x128xbf16>, vector<8x128xf32> -> vector<8x128xf32>
    %189 = arith.addf %186, %188 : vector<8x128xf32>
    %190 = arith.negf %189 : vector<8x128xf32>
    %191 = math.exp %190 : vector<8x128xf32>
    %cst_99 = arith.constant 1.000000e+00 : f32
    %192 = vector.broadcast %cst_99 : f32 to vector<8x128xf32>
    %193 = arith.addf %192, %191 : vector<8x128xf32>
    %194 = arith.divf %192, %193 : vector<8x128xf32>
    %195 = arith.mulf %168, %132 : vector<8x128xf32>
    %196 = arith.mulf %153, %179 : vector<8x128xf32>
    %197 = arith.addf %195, %196 : vector<8x128xf32>
    %198 = math.tanh %197 : vector<8x128xf32>
    %199 = arith.mulf %194, %198 : vector<8x128xf32>
    %c3_i32 = arith.constant 3 : i32
    %200 = arith.index_cast %c3_i32 : i32 to index
    %c0_100 = arith.constant 0 : index
    %c0_101 = arith.constant 0 : index
    %201 = vector.load %arg2[%200, %c0_100, %c0_101] : memref<8x8x1xf32, #tpu.memory_space<vmem>>, vector<1x8x1xf32>
    %202 = vector.shape_cast %201 : vector<1x8x1xf32> to vector<8x1xf32>
    %203 = arith.truncf %199 : vector<8x128xf32> to vector<8x128xbf16>
    %c0_102 = arith.constant 0 : index
    %c0_103 = arith.constant 0 : index
    %204 = vector.load %arg3[%c0_102, %c0_103] : memref<1x512xf32, #tpu.memory_space<vmem>>, vector<1x128xf32>
    %205 = vector.broadcast %202 : vector<8x1xf32> to vector<8x128xf32>
    %206 = vector.broadcast %204 : vector<1x128xf32> to vector<8x128xf32>
    %207 = arith.mulf %205, %206 : vector<8x128xf32>
    %c0_104 = arith.constant 0 : index
    %c0_105 = arith.constant 0 : index
    %208 = vector.load %arg4[%c0_104, %c0_105] : memref<1x512xf32, #tpu.memory_space<vmem>>, vector<1x128xf32>
    %209 = vector.broadcast %208 : vector<1x128xf32> to vector<8x128xf32>
    %210 = arith.addf %207, %209 : vector<8x128xf32>
    %c0_106 = arith.constant 0 : index
    %c0_107 = arith.constant 0 : index
    %211 = vector.load %arg5[%c0_106, %c0_107] : memref<128x512xbf16, #tpu.memory_space<vmem>>, vector<128x128xbf16>
    %cst_108 = arith.constant dense<0.000000e+00> : vector<8x128xf32>
    %212 = tpu.matmul %203, %211, %cst_108 {dimension_numbers = #tpu.dot_dimension_numbers<[1], [0], [0], [1], [0, 0, 1, 1], [], []>} : vector<8x128xbf16>, vector<128x128xbf16>, vector<8x128xf32> -> vector<8x128xf32>
    %213 = arith.addf %210, %212 : vector<8x128xf32>
    %214 = arith.negf %213 : vector<8x128xf32>
    %215 = math.exp %214 : vector<8x128xf32>
    %cst_109 = arith.constant 1.000000e+00 : f32
    %216 = vector.broadcast %cst_109 : f32 to vector<8x128xf32>
    %217 = arith.addf %216, %215 : vector<8x128xf32>
    %218 = arith.divf %216, %217 : vector<8x128xf32>
    %c0_110 = arith.constant 0 : index
    %c128_111 = arith.constant 128 : index
    %219 = vector.load %arg3[%c0_110, %c128_111] : memref<1x512xf32, #tpu.memory_space<vmem>>, vector<1x128xf32>
    %220 = vector.broadcast %202 : vector<8x1xf32> to vector<8x128xf32>
    %221 = vector.broadcast %219 : vector<1x128xf32> to vector<8x128xf32>
    %222 = arith.mulf %220, %221 : vector<8x128xf32>
    %c0_112 = arith.constant 0 : index
    %c128_113 = arith.constant 128 : index
    %223 = vector.load %arg4[%c0_112, %c128_113] : memref<1x512xf32, #tpu.memory_space<vmem>>, vector<1x128xf32>
    %224 = vector.broadcast %223 : vector<1x128xf32> to vector<8x128xf32>
    %225 = arith.addf %222, %224 : vector<8x128xf32>
    %c0_114 = arith.constant 0 : index
    %c128_115 = arith.constant 128 : index
    %226 = vector.load %arg5[%c0_114, %c128_115] : memref<128x512xbf16, #tpu.memory_space<vmem>>, vector<128x128xbf16>
    %cst_116 = arith.constant dense<0.000000e+00> : vector<8x128xf32>
    %227 = tpu.matmul %203, %226, %cst_116 {dimension_numbers = #tpu.dot_dimension_numbers<[1], [0], [0], [1], [0, 0, 1, 1], [], []>} : vector<8x128xbf16>, vector<128x128xbf16>, vector<8x128xf32> -> vector<8x128xf32>
    %228 = arith.addf %225, %227 : vector<8x128xf32>
    %229 = arith.negf %228 : vector<8x128xf32>
    %230 = math.exp %229 : vector<8x128xf32>
    %cst_117 = arith.constant 1.000000e+00 : f32
    %231 = vector.broadcast %cst_117 : f32 to vector<8x128xf32>
    %232 = arith.addf %231, %230 : vector<8x128xf32>
    %233 = arith.divf %231, %232 : vector<8x128xf32>
    %c0_118 = arith.constant 0 : index
    %c256_119 = arith.constant 256 : index
    %234 = vector.load %arg3[%c0_118, %c256_119] : memref<1x512xf32, #tpu.memory_space<vmem>>, vector<1x128xf32>
    %235 = vector.broadcast %202 : vector<8x1xf32> to vector<8x128xf32>
    %236 = vector.broadcast %234 : vector<1x128xf32> to vector<8x128xf32>
    %237 = arith.mulf %235, %236 : vector<8x128xf32>
    %c0_120 = arith.constant 0 : index
    %c256_121 = arith.constant 256 : index
    %238 = vector.load %arg4[%c0_120, %c256_121] : memref<1x512xf32, #tpu.memory_space<vmem>>, vector<1x128xf32>
    %239 = vector.broadcast %238 : vector<1x128xf32> to vector<8x128xf32>
    %240 = arith.addf %237, %239 : vector<8x128xf32>
    %c0_122 = arith.constant 0 : index
    %c256_123 = arith.constant 256 : index
    %241 = vector.load %arg5[%c0_122, %c256_123] : memref<128x512xbf16, #tpu.memory_space<vmem>>, vector<128x128xbf16>
    %cst_124 = arith.constant dense<0.000000e+00> : vector<8x128xf32>
    %242 = tpu.matmul %203, %241, %cst_124 {dimension_numbers = #tpu.dot_dimension_numbers<[1], [0], [0], [1], [0, 0, 1, 1], [], []>} : vector<8x128xbf16>, vector<128x128xbf16>, vector<8x128xf32> -> vector<8x128xf32>
    %243 = arith.addf %240, %242 : vector<8x128xf32>
    %244 = math.tanh %243 : vector<8x128xf32>
    %c0_125 = arith.constant 0 : index
    %c384_126 = arith.constant 384 : index
    %245 = vector.load %arg3[%c0_125, %c384_126] : memref<1x512xf32, #tpu.memory_space<vmem>>, vector<1x128xf32>
    %246 = vector.broadcast %202 : vector<8x1xf32> to vector<8x128xf32>
    %247 = vector.broadcast %245 : vector<1x128xf32> to vector<8x128xf32>
    %248 = arith.mulf %246, %247 : vector<8x128xf32>
    %c0_127 = arith.constant 0 : index
    %c384_128 = arith.constant 384 : index
    %249 = vector.load %arg4[%c0_127, %c384_128] : memref<1x512xf32, #tpu.memory_space<vmem>>, vector<1x128xf32>
    %250 = vector.broadcast %249 : vector<1x128xf32> to vector<8x128xf32>
    %251 = arith.addf %248, %250 : vector<8x128xf32>
    %c0_129 = arith.constant 0 : index
    %c384_130 = arith.constant 384 : index
    %252 = vector.load %arg5[%c0_129, %c384_130] : memref<128x512xbf16, #tpu.memory_space<vmem>>, vector<128x128xbf16>
    %cst_131 = arith.constant dense<0.000000e+00> : vector<8x128xf32>
    %253 = tpu.matmul %203, %252, %cst_131 {dimension_numbers = #tpu.dot_dimension_numbers<[1], [0], [0], [1], [0, 0, 1, 1], [], []>} : vector<8x128xbf16>, vector<128x128xbf16>, vector<8x128xf32> -> vector<8x128xf32>
    %254 = arith.addf %251, %253 : vector<8x128xf32>
    %255 = arith.negf %254 : vector<8x128xf32>
    %256 = math.exp %255 : vector<8x128xf32>
    %cst_132 = arith.constant 1.000000e+00 : f32
    %257 = vector.broadcast %cst_132 : f32 to vector<8x128xf32>
    %258 = arith.addf %257, %256 : vector<8x128xf32>
    %259 = arith.divf %257, %258 : vector<8x128xf32>
    %260 = arith.mulf %233, %197 : vector<8x128xf32>
    %261 = arith.mulf %218, %244 : vector<8x128xf32>
    %262 = arith.addf %260, %261 : vector<8x128xf32>
    %263 = math.tanh %262 : vector<8x128xf32>
    %264 = arith.mulf %259, %263 : vector<8x128xf32>
    %c4_i32 = arith.constant 4 : i32
    %265 = arith.index_cast %c4_i32 : i32 to index
    %c0_133 = arith.constant 0 : index
    %c0_134 = arith.constant 0 : index
    %266 = vector.load %arg2[%265, %c0_133, %c0_134] : memref<8x8x1xf32, #tpu.memory_space<vmem>>, vector<1x8x1xf32>
    %267 = vector.shape_cast %266 : vector<1x8x1xf32> to vector<8x1xf32>
    %268 = arith.truncf %264 : vector<8x128xf32> to vector<8x128xbf16>
    %c0_135 = arith.constant 0 : index
    %c0_136 = arith.constant 0 : index
    %269 = vector.load %arg3[%c0_135, %c0_136] : memref<1x512xf32, #tpu.memory_space<vmem>>, vector<1x128xf32>
    %270 = vector.broadcast %267 : vector<8x1xf32> to vector<8x128xf32>
    %271 = vector.broadcast %269 : vector<1x128xf32> to vector<8x128xf32>
    %272 = arith.mulf %270, %271 : vector<8x128xf32>
    %c0_137 = arith.constant 0 : index
    %c0_138 = arith.constant 0 : index
    %273 = vector.load %arg4[%c0_137, %c0_138] : memref<1x512xf32, #tpu.memory_space<vmem>>, vector<1x128xf32>
    %274 = vector.broadcast %273 : vector<1x128xf32> to vector<8x128xf32>
    %275 = arith.addf %272, %274 : vector<8x128xf32>
    %c0_139 = arith.constant 0 : index
    %c0_140 = arith.constant 0 : index
    %276 = vector.load %arg5[%c0_139, %c0_140] : memref<128x512xbf16, #tpu.memory_space<vmem>>, vector<128x128xbf16>
    %cst_141 = arith.constant dense<0.000000e+00> : vector<8x128xf32>
    %277 = tpu.matmul %268, %276, %cst_141 {dimension_numbers = #tpu.dot_dimension_numbers<[1], [0], [0], [1], [0, 0, 1, 1], [], []>} : vector<8x128xbf16>, vector<128x128xbf16>, vector<8x128xf32> -> vector<8x128xf32>
    %278 = arith.addf %275, %277 : vector<8x128xf32>
    %279 = arith.negf %278 : vector<8x128xf32>
    %280 = math.exp %279 : vector<8x128xf32>
    %cst_142 = arith.constant 1.000000e+00 : f32
    %281 = vector.broadcast %cst_142 : f32 to vector<8x128xf32>
    %282 = arith.addf %281, %280 : vector<8x128xf32>
    %283 = arith.divf %281, %282 : vector<8x128xf32>
    %c0_143 = arith.constant 0 : index
    %c128_144 = arith.constant 128 : index
    %284 = vector.load %arg3[%c0_143, %c128_144] : memref<1x512xf32, #tpu.memory_space<vmem>>, vector<1x128xf32>
    %285 = vector.broadcast %267 : vector<8x1xf32> to vector<8x128xf32>
    %286 = vector.broadcast %284 : vector<1x128xf32> to vector<8x128xf32>
    %287 = arith.mulf %285, %286 : vector<8x128xf32>
    %c0_145 = arith.constant 0 : index
    %c128_146 = arith.constant 128 : index
    %288 = vector.load %arg4[%c0_145, %c128_146] : memref<1x512xf32, #tpu.memory_space<vmem>>, vector<1x128xf32>
    %289 = vector.broadcast %288 : vector<1x128xf32> to vector<8x128xf32>
    %290 = arith.addf %287, %289 : vector<8x128xf32>
    %c0_147 = arith.constant 0 : index
    %c128_148 = arith.constant 128 : index
    %291 = vector.load %arg5[%c0_147, %c128_148] : memref<128x512xbf16, #tpu.memory_space<vmem>>, vector<128x128xbf16>
    %cst_149 = arith.constant dense<0.000000e+00> : vector<8x128xf32>
    %292 = tpu.matmul %268, %291, %cst_149 {dimension_numbers = #tpu.dot_dimension_numbers<[1], [0], [0], [1], [0, 0, 1, 1], [], []>} : vector<8x128xbf16>, vector<128x128xbf16>, vector<8x128xf32> -> vector<8x128xf32>
    %293 = arith.addf %290, %292 : vector<8x128xf32>
    %294 = arith.negf %293 : vector<8x128xf32>
    %295 = math.exp %294 : vector<8x128xf32>
    %cst_150 = arith.constant 1.000000e+00 : f32
    %296 = vector.broadcast %cst_150 : f32 to vector<8x128xf32>
    %297 = arith.addf %296, %295 : vector<8x128xf32>
    %298 = arith.divf %296, %297 : vector<8x128xf32>
    %c0_151 = arith.constant 0 : index
    %c256_152 = arith.constant 256 : index
    %299 = vector.load %arg3[%c0_151, %c256_152] : memref<1x512xf32, #tpu.memory_space<vmem>>, vector<1x128xf32>
    %300 = vector.broadcast %267 : vector<8x1xf32> to vector<8x128xf32>
    %301 = vector.broadcast %299 : vector<1x128xf32> to vector<8x128xf32>
    %302 = arith.mulf %300, %301 : vector<8x128xf32>
    %c0_153 = arith.constant 0 : index
    %c256_154 = arith.constant 256 : index
    %303 = vector.load %arg4[%c0_153, %c256_154] : memref<1x512xf32, #tpu.memory_space<vmem>>, vector<1x128xf32>
    %304 = vector.broadcast %303 : vector<1x128xf32> to vector<8x128xf32>
    %305 = arith.addf %302, %304 : vector<8x128xf32>
    %c0_155 = arith.constant 0 : index
    %c256_156 = arith.constant 256 : index
    %306 = vector.load %arg5[%c0_155, %c256_156] : memref<128x512xbf16, #tpu.memory_space<vmem>>, vector<128x128xbf16>
    %cst_157 = arith.constant dense<0.000000e+00> : vector<8x128xf32>
    %307 = tpu.matmul %268, %306, %cst_157 {dimension_numbers = #tpu.dot_dimension_numbers<[1], [0], [0], [1], [0, 0, 1, 1], [], []>} : vector<8x128xbf16>, vector<128x128xbf16>, vector<8x128xf32> -> vector<8x128xf32>
    %308 = arith.addf %305, %307 : vector<8x128xf32>
    %309 = math.tanh %308 : vector<8x128xf32>
    %c0_158 = arith.constant 0 : index
    %c384_159 = arith.constant 384 : index
    %310 = vector.load %arg3[%c0_158, %c384_159] : memref<1x512xf32, #tpu.memory_space<vmem>>, vector<1x128xf32>
    %311 = vector.broadcast %267 : vector<8x1xf32> to vector<8x128xf32>
    %312 = vector.broadcast %310 : vector<1x128xf32> to vector<8x128xf32>
    %313 = arith.mulf %311, %312 : vector<8x128xf32>
    %c0_160 = arith.constant 0 : index
    %c384_161 = arith.constant 384 : index
    %314 = vector.load %arg4[%c0_160, %c384_161] : memref<1x512xf32, #tpu.memory_space<vmem>>, vector<1x128xf32>
    %315 = vector.broadcast %314 : vector<1x128xf32> to vector<8x128xf32>
    %316 = arith.addf %313, %315 : vector<8x128xf32>
    %c0_162 = arith.constant 0 : index
    %c384_163 = arith.constant 384 : index
    %317 = vector.load %arg5[%c0_162, %c384_163] : memref<128x512xbf16, #tpu.memory_space<vmem>>, vector<128x128xbf16>
    %cst_164 = arith.constant dense<0.000000e+00> : vector<8x128xf32>
    %318 = tpu.matmul %268, %317, %cst_164 {dimension_numbers = #tpu.dot_dimension_numbers<[1], [0], [0], [1], [0, 0, 1, 1], [], []>} : vector<8x128xbf16>, vector<128x128xbf16>, vector<8x128xf32> -> vector<8x128xf32>
    %319 = arith.addf %316, %318 : vector<8x128xf32>
    %320 = arith.negf %319 : vector<8x128xf32>
    %321 = math.exp %320 : vector<8x128xf32>
    %cst_165 = arith.constant 1.000000e+00 : f32
    %322 = vector.broadcast %cst_165 : f32 to vector<8x128xf32>
    %323 = arith.addf %322, %321 : vector<8x128xf32>
    %324 = arith.divf %322, %323 : vector<8x128xf32>
    %325 = arith.mulf %298, %262 : vector<8x128xf32>
    %326 = arith.mulf %283, %309 : vector<8x128xf32>
    %327 = arith.addf %325, %326 : vector<8x128xf32>
    %328 = math.tanh %327 : vector<8x128xf32>
    %329 = arith.mulf %324, %328 : vector<8x128xf32>
    %c5_i32 = arith.constant 5 : i32
    %330 = arith.index_cast %c5_i32 : i32 to index
    %c0_166 = arith.constant 0 : index
    %c0_167 = arith.constant 0 : index
    %331 = vector.load %arg2[%330, %c0_166, %c0_167] : memref<8x8x1xf32, #tpu.memory_space<vmem>>, vector<1x8x1xf32>
    %332 = vector.shape_cast %331 : vector<1x8x1xf32> to vector<8x1xf32>
    %333 = arith.truncf %329 : vector<8x128xf32> to vector<8x128xbf16>
    %c0_168 = arith.constant 0 : index
    %c0_169 = arith.constant 0 : index
    %334 = vector.load %arg3[%c0_168, %c0_169] : memref<1x512xf32, #tpu.memory_space<vmem>>, vector<1x128xf32>
    %335 = vector.broadcast %332 : vector<8x1xf32> to vector<8x128xf32>
    %336 = vector.broadcast %334 : vector<1x128xf32> to vector<8x128xf32>
    %337 = arith.mulf %335, %336 : vector<8x128xf32>
    %c0_170 = arith.constant 0 : index
    %c0_171 = arith.constant 0 : index
    %338 = vector.load %arg4[%c0_170, %c0_171] : memref<1x512xf32, #tpu.memory_space<vmem>>, vector<1x128xf32>
    %339 = vector.broadcast %338 : vector<1x128xf32> to vector<8x128xf32>
    %340 = arith.addf %337, %339 : vector<8x128xf32>
    %c0_172 = arith.constant 0 : index
    %c0_173 = arith.constant 0 : index
    %341 = vector.load %arg5[%c0_172, %c0_173] : memref<128x512xbf16, #tpu.memory_space<vmem>>, vector<128x128xbf16>
    %cst_174 = arith.constant dense<0.000000e+00> : vector<8x128xf32>
    %342 = tpu.matmul %333, %341, %cst_174 {dimension_numbers = #tpu.dot_dimension_numbers<[1], [0], [0], [1], [0, 0, 1, 1], [], []>} : vector<8x128xbf16>, vector<128x128xbf16>, vector<8x128xf32> -> vector<8x128xf32>
    %343 = arith.addf %340, %342 : vector<8x128xf32>
    %344 = arith.negf %343 : vector<8x128xf32>
    %345 = math.exp %344 : vector<8x128xf32>
    %cst_175 = arith.constant 1.000000e+00 : f32
    %346 = vector.broadcast %cst_175 : f32 to vector<8x128xf32>
    %347 = arith.addf %346, %345 : vector<8x128xf32>
    %348 = arith.divf %346, %347 : vector<8x128xf32>
    %c0_176 = arith.constant 0 : index
    %c128_177 = arith.constant 128 : index
    %349 = vector.load %arg3[%c0_176, %c128_177] : memref<1x512xf32, #tpu.memory_space<vmem>>, vector<1x128xf32>
    %350 = vector.broadcast %332 : vector<8x1xf32> to vector<8x128xf32>
    %351 = vector.broadcast %349 : vector<1x128xf32> to vector<8x128xf32>
    %352 = arith.mulf %350, %351 : vector<8x128xf32>
    %c0_178 = arith.constant 0 : index
    %c128_179 = arith.constant 128 : index
    %353 = vector.load %arg4[%c0_178, %c128_179] : memref<1x512xf32, #tpu.memory_space<vmem>>, vector<1x128xf32>
    %354 = vector.broadcast %353 : vector<1x128xf32> to vector<8x128xf32>
    %355 = arith.addf %352, %354 : vector<8x128xf32>
    %c0_180 = arith.constant 0 : index
    %c128_181 = arith.constant 128 : index
    %356 = vector.load %arg5[%c0_180, %c128_181] : memref<128x512xbf16, #tpu.memory_space<vmem>>, vector<128x128xbf16>
    %cst_182 = arith.constant dense<0.000000e+00> : vector<8x128xf32>
    %357 = tpu.matmul %333, %356, %cst_182 {dimension_numbers = #tpu.dot_dimension_numbers<[1], [0], [0], [1], [0, 0, 1, 1], [], []>} : vector<8x128xbf16>, vector<128x128xbf16>, vector<8x128xf32> -> vector<8x128xf32>
    %358 = arith.addf %355, %357 : vector<8x128xf32>
    %359 = arith.negf %358 : vector<8x128xf32>
    %360 = math.exp %359 : vector<8x128xf32>
    %cst_183 = arith.constant 1.000000e+00 : f32
    %361 = vector.broadcast %cst_183 : f32 to vector<8x128xf32>
    %362 = arith.addf %361, %360 : vector<8x128xf32>
    %363 = arith.divf %361, %362 : vector<8x128xf32>
    %c0_184 = arith.constant 0 : index
    %c256_185 = arith.constant 256 : index
    %364 = vector.load %arg3[%c0_184, %c256_185] : memref<1x512xf32, #tpu.memory_space<vmem>>, vector<1x128xf32>
    %365 = vector.broadcast %332 : vector<8x1xf32> to vector<8x128xf32>
    %366 = vector.broadcast %364 : vector<1x128xf32> to vector<8x128xf32>
    %367 = arith.mulf %365, %366 : vector<8x128xf32>
    %c0_186 = arith.constant 0 : index
    %c256_187 = arith.constant 256 : index
    %368 = vector.load %arg4[%c0_186, %c256_187] : memref<1x512xf32, #tpu.memory_space<vmem>>, vector<1x128xf32>
    %369 = vector.broadcast %368 : vector<1x128xf32> to vector<8x128xf32>
    %370 = arith.addf %367, %369 : vector<8x128xf32>
    %c0_188 = arith.constant 0 : index
    %c256_189 = arith.constant 256 : index
    %371 = vector.load %arg5[%c0_188, %c256_189] : memref<128x512xbf16, #tpu.memory_space<vmem>>, vector<128x128xbf16>
    %cst_190 = arith.constant dense<0.000000e+00> : vector<8x128xf32>
    %372 = tpu.matmul %333, %371, %cst_190 {dimension_numbers = #tpu.dot_dimension_numbers<[1], [0], [0], [1], [0, 0, 1, 1], [], []>} : vector<8x128xbf16>, vector<128x128xbf16>, vector<8x128xf32> -> vector<8x128xf32>
    %373 = arith.addf %370, %372 : vector<8x128xf32>
    %374 = math.tanh %373 : vector<8x128xf32>
    %c0_191 = arith.constant 0 : index
    %c384_192 = arith.constant 384 : index
    %375 = vector.load %arg3[%c0_191, %c384_192] : memref<1x512xf32, #tpu.memory_space<vmem>>, vector<1x128xf32>
    %376 = vector.broadcast %332 : vector<8x1xf32> to vector<8x128xf32>
    %377 = vector.broadcast %375 : vector<1x128xf32> to vector<8x128xf32>
    %378 = arith.mulf %376, %377 : vector<8x128xf32>
    %c0_193 = arith.constant 0 : index
    %c384_194 = arith.constant 384 : index
    %379 = vector.load %arg4[%c0_193, %c384_194] : memref<1x512xf32, #tpu.memory_space<vmem>>, vector<1x128xf32>
    %380 = vector.broadcast %379 : vector<1x128xf32> to vector<8x128xf32>
    %381 = arith.addf %378, %380 : vector<8x128xf32>
    %c0_195 = arith.constant 0 : index
    %c384_196 = arith.constant 384 : index
    %382 = vector.load %arg5[%c0_195, %c384_196] : memref<128x512xbf16, #tpu.memory_space<vmem>>, vector<128x128xbf16>
    %cst_197 = arith.constant dense<0.000000e+00> : vector<8x128xf32>
    %383 = tpu.matmul %333, %382, %cst_197 {dimension_numbers = #tpu.dot_dimension_numbers<[1], [0], [0], [1], [0, 0, 1, 1], [], []>} : vector<8x128xbf16>, vector<128x128xbf16>, vector<8x128xf32> -> vector<8x128xf32>
    %384 = arith.addf %381, %383 : vector<8x128xf32>
    %385 = arith.negf %384 : vector<8x128xf32>
    %386 = math.exp %385 : vector<8x128xf32>
    %cst_198 = arith.constant 1.000000e+00 : f32
    %387 = vector.broadcast %cst_198 : f32 to vector<8x128xf32>
    %388 = arith.addf %387, %386 : vector<8x128xf32>
    %389 = arith.divf %387, %388 : vector<8x128xf32>
    %390 = arith.mulf %363, %327 : vector<8x128xf32>
    %391 = arith.mulf %348, %374 : vector<8x128xf32>
    %392 = arith.addf %390, %391 : vector<8x128xf32>
    %393 = math.tanh %392 : vector<8x128xf32>
    %394 = arith.mulf %389, %393 : vector<8x128xf32>
    %c6_i32 = arith.constant 6 : i32
    %395 = arith.index_cast %c6_i32 : i32 to index
    %c0_199 = arith.constant 0 : index
    %c0_200 = arith.constant 0 : index
    %396 = vector.load %arg2[%395, %c0_199, %c0_200] : memref<8x8x1xf32, #tpu.memory_space<vmem>>, vector<1x8x1xf32>
    %397 = vector.shape_cast %396 : vector<1x8x1xf32> to vector<8x1xf32>
    %398 = arith.truncf %394 : vector<8x128xf32> to vector<8x128xbf16>
    %c0_201 = arith.constant 0 : index
    %c0_202 = arith.constant 0 : index
    %399 = vector.load %arg3[%c0_201, %c0_202] : memref<1x512xf32, #tpu.memory_space<vmem>>, vector<1x128xf32>
    %400 = vector.broadcast %397 : vector<8x1xf32> to vector<8x128xf32>
    %401 = vector.broadcast %399 : vector<1x128xf32> to vector<8x128xf32>
    %402 = arith.mulf %400, %401 : vector<8x128xf32>
    %c0_203 = arith.constant 0 : index
    %c0_204 = arith.constant 0 : index
    %403 = vector.load %arg4[%c0_203, %c0_204] : memref<1x512xf32, #tpu.memory_space<vmem>>, vector<1x128xf32>
    %404 = vector.broadcast %403 : vector<1x128xf32> to vector<8x128xf32>
    %405 = arith.addf %402, %404 : vector<8x128xf32>
    %c0_205 = arith.constant 0 : index
    %c0_206 = arith.constant 0 : index
    %406 = vector.load %arg5[%c0_205, %c0_206] : memref<128x512xbf16, #tpu.memory_space<vmem>>, vector<128x128xbf16>
    %cst_207 = arith.constant dense<0.000000e+00> : vector<8x128xf32>
    %407 = tpu.matmul %398, %406, %cst_207 {dimension_numbers = #tpu.dot_dimension_numbers<[1], [0], [0], [1], [0, 0, 1, 1], [], []>} : vector<8x128xbf16>, vector<128x128xbf16>, vector<8x128xf32> -> vector<8x128xf32>
    %408 = arith.addf %405, %407 : vector<8x128xf32>
    %409 = arith.negf %408 : vector<8x128xf32>
    %410 = math.exp %409 : vector<8x128xf32>
    %cst_208 = arith.constant 1.000000e+00 : f32
    %411 = vector.broadcast %cst_208 : f32 to vector<8x128xf32>
    %412 = arith.addf %411, %410 : vector<8x128xf32>
    %413 = arith.divf %411, %412 : vector<8x128xf32>
    %c0_209 = arith.constant 0 : index
    %c128_210 = arith.constant 128 : index
    %414 = vector.load %arg3[%c0_209, %c128_210] : memref<1x512xf32, #tpu.memory_space<vmem>>, vector<1x128xf32>
    %415 = vector.broadcast %397 : vector<8x1xf32> to vector<8x128xf32>
    %416 = vector.broadcast %414 : vector<1x128xf32> to vector<8x128xf32>
    %417 = arith.mulf %415, %416 : vector<8x128xf32>
    %c0_211 = arith.constant 0 : index
    %c128_212 = arith.constant 128 : index
    %418 = vector.load %arg4[%c0_211, %c128_212] : memref<1x512xf32, #tpu.memory_space<vmem>>, vector<1x128xf32>
    %419 = vector.broadcast %418 : vector<1x128xf32> to vector<8x128xf32>
    %420 = arith.addf %417, %419 : vector<8x128xf32>
    %c0_213 = arith.constant 0 : index
    %c128_214 = arith.constant 128 : index
    %421 = vector.load %arg5[%c0_213, %c128_214] : memref<128x512xbf16, #tpu.memory_space<vmem>>, vector<128x128xbf16>
    %cst_215 = arith.constant dense<0.000000e+00> : vector<8x128xf32>
    %422 = tpu.matmul %398, %421, %cst_215 {dimension_numbers = #tpu.dot_dimension_numbers<[1], [0], [0], [1], [0, 0, 1, 1], [], []>} : vector<8x128xbf16>, vector<128x128xbf16>, vector<8x128xf32> -> vector<8x128xf32>
    %423 = arith.addf %420, %422 : vector<8x128xf32>
    %424 = arith.negf %423 : vector<8x128xf32>
    %425 = math.exp %424 : vector<8x128xf32>
    %cst_216 = arith.constant 1.000000e+00 : f32
    %426 = vector.broadcast %cst_216 : f32 to vector<8x128xf32>
    %427 = arith.addf %426, %425 : vector<8x128xf32>
    %428 = arith.divf %426, %427 : vector<8x128xf32>
    %c0_217 = arith.constant 0 : index
    %c256_218 = arith.constant 256 : index
    %429 = vector.load %arg3[%c0_217, %c256_218] : memref<1x512xf32, #tpu.memory_space<vmem>>, vector<1x128xf32>
    %430 = vector.broadcast %397 : vector<8x1xf32> to vector<8x128xf32>
    %431 = vector.broadcast %429 : vector<1x128xf32> to vector<8x128xf32>
    %432 = arith.mulf %430, %431 : vector<8x128xf32>
    %c0_219 = arith.constant 0 : index
    %c256_220 = arith.constant 256 : index
    %433 = vector.load %arg4[%c0_219, %c256_220] : memref<1x512xf32, #tpu.memory_space<vmem>>, vector<1x128xf32>
    %434 = vector.broadcast %433 : vector<1x128xf32> to vector<8x128xf32>
    %435 = arith.addf %432, %434 : vector<8x128xf32>
    %c0_221 = arith.constant 0 : index
    %c256_222 = arith.constant 256 : index
    %436 = vector.load %arg5[%c0_221, %c256_222] : memref<128x512xbf16, #tpu.memory_space<vmem>>, vector<128x128xbf16>
    %cst_223 = arith.constant dense<0.000000e+00> : vector<8x128xf32>
    %437 = tpu.matmul %398, %436, %cst_223 {dimension_numbers = #tpu.dot_dimension_numbers<[1], [0], [0], [1], [0, 0, 1, 1], [], []>} : vector<8x128xbf16>, vector<128x128xbf16>, vector<8x128xf32> -> vector<8x128xf32>
    %438 = arith.addf %435, %437 : vector<8x128xf32>
    %439 = math.tanh %438 : vector<8x128xf32>
    %c0_224 = arith.constant 0 : index
    %c384_225 = arith.constant 384 : index
    %440 = vector.load %arg3[%c0_224, %c384_225] : memref<1x512xf32, #tpu.memory_space<vmem>>, vector<1x128xf32>
    %441 = vector.broadcast %397 : vector<8x1xf32> to vector<8x128xf32>
    %442 = vector.broadcast %440 : vector<1x128xf32> to vector<8x128xf32>
    %443 = arith.mulf %441, %442 : vector<8x128xf32>
    %c0_226 = arith.constant 0 : index
    %c384_227 = arith.constant 384 : index
    %444 = vector.load %arg4[%c0_226, %c384_227] : memref<1x512xf32, #tpu.memory_space<vmem>>, vector<1x128xf32>
    %445 = vector.broadcast %444 : vector<1x128xf32> to vector<8x128xf32>
    %446 = arith.addf %443, %445 : vector<8x128xf32>
    %c0_228 = arith.constant 0 : index
    %c384_229 = arith.constant 384 : index
    %447 = vector.load %arg5[%c0_228, %c384_229] : memref<128x512xbf16, #tpu.memory_space<vmem>>, vector<128x128xbf16>
    %cst_230 = arith.constant dense<0.000000e+00> : vector<8x128xf32>
    %448 = tpu.matmul %398, %447, %cst_230 {dimension_numbers = #tpu.dot_dimension_numbers<[1], [0], [0], [1], [0, 0, 1, 1], [], []>} : vector<8x128xbf16>, vector<128x128xbf16>, vector<8x128xf32> -> vector<8x128xf32>
    %449 = arith.addf %446, %448 : vector<8x128xf32>
    %450 = arith.negf %449 : vector<8x128xf32>
    %451 = math.exp %450 : vector<8x128xf32>
    %cst_231 = arith.constant 1.000000e+00 : f32
    %452 = vector.broadcast %cst_231 : f32 to vector<8x128xf32>
    %453 = arith.addf %452, %451 : vector<8x128xf32>
    %454 = arith.divf %452, %453 : vector<8x128xf32>
    %455 = arith.mulf %428, %392 : vector<8x128xf32>
    %456 = arith.mulf %413, %439 : vector<8x128xf32>
    %457 = arith.addf %455, %456 : vector<8x128xf32>
    %458 = math.tanh %457 : vector<8x128xf32>
    %459 = arith.mulf %454, %458 : vector<8x128xf32>
    %c7_i32 = arith.constant 7 : i32
    %460 = arith.index_cast %c7_i32 : i32 to index
    %c0_232 = arith.constant 0 : index
    %c0_233 = arith.constant 0 : index
    %461 = vector.load %arg2[%460, %c0_232, %c0_233] : memref<8x8x1xf32, #tpu.memory_space<vmem>>, vector<1x8x1xf32>
    %462 = vector.shape_cast %461 : vector<1x8x1xf32> to vector<8x1xf32>
    %463 = arith.truncf %459 : vector<8x128xf32> to vector<8x128xbf16>
    %c0_234 = arith.constant 0 : index
    %c0_235 = arith.constant 0 : index
    %464 = vector.load %arg3[%c0_234, %c0_235] : memref<1x512xf32, #tpu.memory_space<vmem>>, vector<1x128xf32>
    %465 = vector.broadcast %462 : vector<8x1xf32> to vector<8x128xf32>
    %466 = vector.broadcast %464 : vector<1x128xf32> to vector<8x128xf32>
    %467 = arith.mulf %465, %466 : vector<8x128xf32>
    %c0_236 = arith.constant 0 : index
    %c0_237 = arith.constant 0 : index
    %468 = vector.load %arg4[%c0_236, %c0_237] : memref<1x512xf32, #tpu.memory_space<vmem>>, vector<1x128xf32>
    %469 = vector.broadcast %468 : vector<1x128xf32> to vector<8x128xf32>
    %470 = arith.addf %467, %469 : vector<8x128xf32>
    %c0_238 = arith.constant 0 : index
    %c0_239 = arith.constant 0 : index
    %471 = vector.load %arg5[%c0_238, %c0_239] : memref<128x512xbf16, #tpu.memory_space<vmem>>, vector<128x128xbf16>
    %cst_240 = arith.constant dense<0.000000e+00> : vector<8x128xf32>
    %472 = tpu.matmul %463, %471, %cst_240 {dimension_numbers = #tpu.dot_dimension_numbers<[1], [0], [0], [1], [0, 0, 1, 1], [], []>} : vector<8x128xbf16>, vector<128x128xbf16>, vector<8x128xf32> -> vector<8x128xf32>
    %473 = arith.addf %470, %472 : vector<8x128xf32>
    %474 = arith.negf %473 : vector<8x128xf32>
    %475 = math.exp %474 : vector<8x128xf32>
    %cst_241 = arith.constant 1.000000e+00 : f32
    %476 = vector.broadcast %cst_241 : f32 to vector<8x128xf32>
    %477 = arith.addf %476, %475 : vector<8x128xf32>
    %478 = arith.divf %476, %477 : vector<8x128xf32>
    %c0_242 = arith.constant 0 : index
    %c128_243 = arith.constant 128 : index
    %479 = vector.load %arg3[%c0_242, %c128_243] : memref<1x512xf32, #tpu.memory_space<vmem>>, vector<1x128xf32>
    %480 = vector.broadcast %462 : vector<8x1xf32> to vector<8x128xf32>
    %481 = vector.broadcast %479 : vector<1x128xf32> to vector<8x128xf32>
    %482 = arith.mulf %480, %481 : vector<8x128xf32>
    %c0_244 = arith.constant 0 : index
    %c128_245 = arith.constant 128 : index
    %483 = vector.load %arg4[%c0_244, %c128_245] : memref<1x512xf32, #tpu.memory_space<vmem>>, vector<1x128xf32>
    %484 = vector.broadcast %483 : vector<1x128xf32> to vector<8x128xf32>
    %485 = arith.addf %482, %484 : vector<8x128xf32>
    %c0_246 = arith.constant 0 : index
    %c128_247 = arith.constant 128 : index
    %486 = vector.load %arg5[%c0_246, %c128_247] : memref<128x512xbf16, #tpu.memory_space<vmem>>, vector<128x128xbf16>
    %cst_248 = arith.constant dense<0.000000e+00> : vector<8x128xf32>
    %487 = tpu.matmul %463, %486, %cst_248 {dimension_numbers = #tpu.dot_dimension_numbers<[1], [0], [0], [1], [0, 0, 1, 1], [], []>} : vector<8x128xbf16>, vector<128x128xbf16>, vector<8x128xf32> -> vector<8x128xf32>
    %488 = arith.addf %485, %487 : vector<8x128xf32>
    %489 = arith.negf %488 : vector<8x128xf32>
    %490 = math.exp %489 : vector<8x128xf32>
    %cst_249 = arith.constant 1.000000e+00 : f32
    %491 = vector.broadcast %cst_249 : f32 to vector<8x128xf32>
    %492 = arith.addf %491, %490 : vector<8x128xf32>
    %493 = arith.divf %491, %492 : vector<8x128xf32>
    %c0_250 = arith.constant 0 : index
    %c256_251 = arith.constant 256 : index
    %494 = vector.load %arg3[%c0_250, %c256_251] : memref<1x512xf32, #tpu.memory_space<vmem>>, vector<1x128xf32>
    %495 = vector.broadcast %462 : vector<8x1xf32> to vector<8x128xf32>
    %496 = vector.broadcast %494 : vector<1x128xf32> to vector<8x128xf32>
    %497 = arith.mulf %495, %496 : vector<8x128xf32>
    %c0_252 = arith.constant 0 : index
    %c256_253 = arith.constant 256 : index
    %498 = vector.load %arg4[%c0_252, %c256_253] : memref<1x512xf32, #tpu.memory_space<vmem>>, vector<1x128xf32>
    %499 = vector.broadcast %498 : vector<1x128xf32> to vector<8x128xf32>
    %500 = arith.addf %497, %499 : vector<8x128xf32>
    %c0_254 = arith.constant 0 : index
    %c256_255 = arith.constant 256 : index
    %501 = vector.load %arg5[%c0_254, %c256_255] : memref<128x512xbf16, #tpu.memory_space<vmem>>, vector<128x128xbf16>
    %cst_256 = arith.constant dense<0.000000e+00> : vector<8x128xf32>
    %502 = tpu.matmul %463, %501, %cst_256 {dimension_numbers = #tpu.dot_dimension_numbers<[1], [0], [0], [1], [0, 0, 1, 1], [], []>} : vector<8x128xbf16>, vector<128x128xbf16>, vector<8x128xf32> -> vector<8x128xf32>
    %503 = arith.addf %500, %502 : vector<8x128xf32>
    %504 = math.tanh %503 : vector<8x128xf32>
    %c0_257 = arith.constant 0 : index
    %c384_258 = arith.constant 384 : index
    %505 = vector.load %arg3[%c0_257, %c384_258] : memref<1x512xf32, #tpu.memory_space<vmem>>, vector<1x128xf32>
    %506 = vector.broadcast %462 : vector<8x1xf32> to vector<8x128xf32>
    %507 = vector.broadcast %505 : vector<1x128xf32> to vector<8x128xf32>
    %508 = arith.mulf %506, %507 : vector<8x128xf32>
    %c0_259 = arith.constant 0 : index
    %c384_260 = arith.constant 384 : index
    %509 = vector.load %arg4[%c0_259, %c384_260] : memref<1x512xf32, #tpu.memory_space<vmem>>, vector<1x128xf32>
    %510 = vector.broadcast %509 : vector<1x128xf32> to vector<8x128xf32>
    %511 = arith.addf %508, %510 : vector<8x128xf32>
    %c0_261 = arith.constant 0 : index
    %c384_262 = arith.constant 384 : index
    %512 = vector.load %arg5[%c0_261, %c384_262] : memref<128x512xbf16, #tpu.memory_space<vmem>>, vector<128x128xbf16>
    %cst_263 = arith.constant dense<0.000000e+00> : vector<8x128xf32>
    %513 = tpu.matmul %463, %512, %cst_263 {dimension_numbers = #tpu.dot_dimension_numbers<[1], [0], [0], [1], [0, 0, 1, 1], [], []>} : vector<8x128xbf16>, vector<128x128xbf16>, vector<8x128xf32> -> vector<8x128xf32>
    %514 = arith.addf %511, %513 : vector<8x128xf32>
    %515 = arith.negf %514 : vector<8x128xf32>
    %516 = math.exp %515 : vector<8x128xf32>
    %cst_264 = arith.constant 1.000000e+00 : f32
    %517 = vector.broadcast %cst_264 : f32 to vector<8x128xf32>
    %518 = arith.addf %517, %516 : vector<8x128xf32>
    %519 = arith.divf %517, %518 : vector<8x128xf32>
    %520 = arith.mulf %493, %457 : vector<8x128xf32>
    %521 = arith.mulf %478, %504 : vector<8x128xf32>
    %522 = arith.addf %520, %521 : vector<8x128xf32>
    %523 = math.tanh %522 : vector<8x128xf32>
    %524 = arith.mulf %519, %523 : vector<8x128xf32>
    %c8_i32 = arith.constant 8 : i32
    %c0_265 = arith.constant 0 : index
    %c0_266 = arith.constant 0 : index
    %525 = vector.load %arg9[%c0_265, %c0_266] : memref<8x128xf32, #tpu.memory_space<vmem>>, vector<8x128xf32>
    tpu.vector_store %arg9[%c0_265, %c0_266], %524 {strides = array<i32>} : memref<8x128xf32, #tpu.memory_space<vmem>>, vector<8x128xf32>,
    %c0_267 = arith.constant 0 : index
    %c0_268 = arith.constant 0 : index
    %526 = vector.load %arg10[%c0_267, %c0_268] : memref<8x128xf32, #tpu.memory_space<vmem>>, vector<8x128xf32>
    tpu.vector_store %arg10[%c0_267, %c0_268], %522 {strides = array<i32>} : memref<8x128xf32, #tpu.memory_space<vmem>>, vector<8x128xf32>,
    %c0_i32_269 = arith.constant 0 : i32
    %527 = arith.cmpi eq, %arg1, %c0_i32_269 : i32
    %528 = arith.extui %527 : i1 to i32
    %c0_i32_270 = arith.constant 0 : i32
    %529 = arith.cmpi ne, %528, %c0_i32_270 : i32
    scf.if %529 {
      %c0_271 = arith.constant 0 : index
      %c0_272 = arith.constant 0 : index
      %530 = vector.load %arg6[%c0_271, %c0_272] : memref<128x128xf32, #tpu.memory_space<vmem>>, vector<128x128xf32>
      %cst_273 = arith.constant dense<0.000000e+00> : vector<8x128xf32>
      %531 = tpu.matmul %524, %530, %cst_273 {dimension_numbers = #tpu.dot_dimension_numbers<[1], [0], [0], [1], [0, 0, 1, 1], [], []>} : vector<8x128xf32>, vector<128x128xf32>, vector<8x128xf32> -> vector<8x128xf32>
      %c0_274 = arith.constant 0 : index
      %c0_275 = arith.constant 0 : index
      %532 = vector.load %arg7[%c0_274, %c0_275] : memref<1x128xf32, #tpu.memory_space<vmem>>, vector<1x128xf32>
      %533 = vector.broadcast %532 : vector<1x128xf32> to vector<8x128xf32>
      %534 = arith.addf %531, %533 : vector<8x128xf32>
      %c0_276 = arith.constant 0 : index
      %c0_277 = arith.constant 0 : index
      %535 = vector.load %arg8[%c0_276, %c0_277] : memref<8x128xf32, #tpu.memory_space<vmem>>, vector<8x128xf32>
      tpu.vector_store %arg8[%c0_276, %c0_277], %534 {strides = array<i32>} : memref<8x128xf32, #tpu.memory_space<vmem>>, vector<8x128xf32>,
    } else {
    }
    return
  }
  func.func @transform_0(%arg0: i32, %arg1: i32) -> (i32, i32, i32) {
    %c0_i32 = arith.constant 0 : i32
    %c0_i32_0 = arith.constant 0 : i32
    return %arg1, %arg0, %c0_i32 : i32, i32, i32
  }
  func.func @transform_1(%arg0: i32, %arg1: i32) -> (i32, i32) {
    %c0_i32 = arith.constant 0 : i32
    %c0_i32_0 = arith.constant 0 : i32
    %c0_i32_1 = arith.constant 0 : i32
    return %c0_i32, %c0_i32_0 : i32, i32
  }
  func.func @transform_2(%arg0: i32, %arg1: i32) -> (i32, i32) {
    %c0_i32 = arith.constant 0 : i32
    %c0_i32_0 = arith.constant 0 : i32
    %c0_i32_1 = arith.constant 0 : i32
    return %c0_i32, %c0_i32_0 : i32, i32
  }
  func.func @transform_3(%arg0: i32, %arg1: i32) -> (i32, i32) {
    %c0_i32 = arith.constant 0 : i32
    %c0_i32_0 = arith.constant 0 : i32
    %c0_i32_1 = arith.constant 0 : i32
    return %c0_i32, %c0_i32_0 : i32, i32
  }
  func.func @transform_4(%arg0: i32, %arg1: i32) -> (i32, i32) {
    %c0_i32 = arith.constant 0 : i32
    %c0_i32_0 = arith.constant 0 : i32
    %c0_i32_1 = arith.constant 0 : i32
    return %c0_i32, %c0_i32_0 : i32, i32
  }
  func.func @transform_5(%arg0: i32, %arg1: i32) -> (i32, i32) {
    %c0_i32 = arith.constant 0 : i32
    %c0_i32_0 = arith.constant 0 : i32
    %c0_i32_1 = arith.constant 0 : i32
    return %c0_i32, %c0_i32_0 : i32, i32
  }
  func.func @transform_6(%arg0: i32, %arg1: i32) -> (i32, i32) {
    %c0_i32 = arith.constant 0 : i32
    %c0_i32_0 = arith.constant 0 : i32
    return %arg0, %c0_i32 : i32, i32
  }
}

</mosaic_0001>

<bundles_post_ra>
// kernel: tpu_custom_call.1
= control target key start
LH: loop header
LB: loop body
LE: loop exit
PB: predicated region body
PF: predicated region fallthrough
CT: control target
= control target key end

     0   :  { %11 = vsyncpa [#allocation5], 0  ;;  %s2493_s0 = inlined_call_operand.vmem [shape: f32[8,8,1], index: 0, kind: input, shape index: {}]   ;;  %s2494_s1 = inlined_call_operand.vmem [shape: f32[1,512], index: 1, kind: input, shape index: {}]   ;;  %s2495_s2 = inlined_call_operand.vmem [shape: f32[1,512], index: 2, kind: input, shape index: {}]   ;;  %s2496_s3 = inlined_call_operand.hbm [shape: bf16[128,512], index: 3, kind: input, shape index: {}]   ;;  %s2497_s4 = inlined_call_operand.hbm [shape: f32[128,128], index: 4, kind: input, shape index: {}]   ;;  %s2498_s5 = inlined_call_operand.vmem [shape: f32[1,128], index: 5, kind: input, shape index: {}]   ;;  %s2499_s6 = inlined_call_operand.hbm [shape: f32[8,128], index: 6, kind: output, shape index: {}]  }
   0x1   :  { %12 = vsyncpa [#allocation8], 0 }
   0x2   :  { %13 = vsyncpa [#allocation6], 0  ;;  %s24_s23 = sshll.u32 %s2496_s3, 4  ;;  %s1921_s24 = smov [#allocation4]   ;;  %s25_s23 = int_to_ptr.hbm [resolvable:$true] %s24_s23 }
   0x3   :  { %s26_s25 = sshll.u32 %s1921_s24, 4  ;;  %s37_s28 = sshll.u32 %s2497_s4, 4  ;;  %s27_s25 = int_to_ptr.vmem [resolvable:$true] %s26_s25  ;;  %s38_s28 = int_to_ptr.hbm [resolvable:$true] %s37_s28 }
   0x4   :  { %s1922_s29 = smov 256   ;;  %s1923_s30 = smov 16  }
   0x5   :  { %32 = dma.hbm_to_vmem [thread:$0]  %s25_s23, 4096, %s27_s25, [#allocation5], %s1922_s29, %s1922_s29, %s1923_s30  }
   0x6   :  { %s1924_s7 = smov [#allocation7]   ;;  %s1925_s9 = smov 128  }
   0x7   :  { %s39_s8 = sshll.u32 %s1924_s7, 4  ;;  %s1926_s10 = smov 8   ;;  %s40_s8 = int_to_ptr.vmem [resolvable:$true] %s39_s8 }
   0x8   :  { %45 = dma.hbm_to_vmem [thread:$0]  %s38_s28, 2048, %s40_s8, [#allocation8], %s1925_s9, %s1925_s9, %s1926_s10  }
   0x9   :  { %1915 = dma.done.wait [#allocation5], 4096  }
   0xa   :  { %1916 = vsyncadd [#allocation5], 4294963200 }
   0xb   :  { %1917 = dma.done.wait [#allocation8], 2048  }
   0xc   :  { %1918 = vsyncadd [#allocation8], 4294965248  ;;  %v1927_v0 = vmov 0   ;;  %v1525_v1 = vld [vmem:[#allocation4 + $0xe0] sm:$0xf]  ;;  %s1929_s30 = smov [#allocation9]  }
   0xd   :  { %1695 = vset.pattern.permute.xlu0 %v1927_v0  ;;  %1696 = vset.pattern.permute.xlu1 %v1927_v0  ;;  %v1661_v2 = vld [vmem:[#allocation4 + $0xec] sm:$0xf0]  ;;  %v1558_v3 = vld [vmem:[#allocation4 + $0xe4] sm:$0xf]  ;;  %v1669_v5 = vld [vmem:[#allocation4 + $0xf0] sm:$0xf0] }
   0xe   :  { %1697 = vset.pattern.permute.xlu2 %v1927_v0  ;;  %v1971_v4 = vor.u32 %v1661_v2, %v1525_v1  ;;  %v1591_v6 = vld [vmem:[#allocation4 + $0xe8] sm:$0xf]  ;;  %v1677_v7 = vld [vmem:[#allocation4 + $0xf4] sm:$0xf0]  ;;  %v1973_v8 = vor.u32 %v1669_v5, %v1558_v3  ;;  %v1623_v10 = vld [vmem:[#allocation4 + $0xec] sm:$0xf] }
   0xf   :  { %v1975_v9 = vor.u32 %v1677_v7, %v1591_v6  ;;  %v1685_v11 = vld [vmem:[#allocation4 + $0xf8] sm:$0xf0]  ;;  %v1521_v12 = vld [vmem:[#allocation4 + $0xc0] sm:$0xf]  ;;  %v1660_v14 = vld [vmem:[#allocation4 + $0xcc] sm:$0xf0] }
  0x10   :  { %145 = vmatpush.bf16.msra.mxu0 %v1971_v4  ;;  %v1978_v13 = vor.u32 %v1685_v11, %v1623_v10  ;;  %v1554_v15 = vld [vmem:[#allocation4 + $0xc4] sm:$0xf]  ;;  %v1668_v16 = vld [vmem:[#allocation4 + $0xd0] sm:$0xf0]  ;;  %252 = vmatpush.bf16.msra.mxu1 %v1973_v8  ;;  %v1982_v17 = vor.u32 %v1660_v14, %v1521_v12  ;;  %v1587_v19 = vld [vmem:[#allocation4 + $0xc8] sm:$0xf] }
  0x11   :  { %359 = vmatpush.bf16.msra.mxu2 %v1975_v9  ;;  %v1984_v18 = vor.u32 %v1668_v16, %v1554_v15  ;;  %v1676_v20 = vld [vmem:[#allocation4 + $0xd4] sm:$0xf0]  ;;  %v1619_v21 = vld [vmem:[#allocation4 + $0xcc] sm:$0xf]  ;;  %v1684_v23 = vld [vmem:[#allocation4 + $0xd8] sm:$0xf0] }
  0x12   :  { %448 = vmatpush.bf16.msra.mxu3 %v1978_v13  ;;  %v1987_v22 = vor.u32 %v1676_v20, %v1587_v19  ;;  %v1517_v24 = vld [vmem:[#allocation4 + $0xa0] sm:$0xf]  ;;  %v1659_v25 = vld [vmem:[#allocation4 + $0xac] sm:$0xf0]  ;;  %v1989_v26 = vor.u32 %v1684_v23, %v1619_v21  ;;  %v1550_v27 = vld [vmem:[#allocation4 + $0xa4] sm:$0xf] }
  0x13   :  { %v1667_v28 = vld [vmem:[#allocation4 + $0xb0] sm:$0xf0]  ;;  %v1583_v29 = vld [vmem:[#allocation4 + $0xa8] sm:$0xf]  ;;  %v1992_v30 = vor.u32 %v1659_v25, %v1517_v24  ;;  %v1675_v31 = vld [vmem:[#allocation4 + $0xb4] sm:$0xf0] }
  0x14   :  { %146 = vmatpush.bf16.msra.mxu0 %v1982_v17  ;;  %v1615_v32 = vld [vmem:[#allocation4 + $0xac] sm:$0xf]  ;;  %v1683_v33 = vld [vmem:[#allocation4 + $0xb8] sm:$0xf0]  ;;  %253 = vmatpush.bf16.msra.mxu1 %v1984_v18  ;;  %v1996_v34 = vor.u32 %v1667_v28, %v1550_v27  ;;  %v1998_v35 = vor.u32 %v1675_v31, %v1583_v29  ;;  %v1513_v36 = vld [vmem:[#allocation4 + $0x80] sm:$0xf] }
  0x15   :  { %360 = vmatpush.bf16.msra.mxu2 %v1987_v22  ;;  %v1658_v37 = vld [vmem:[#allocation4 + $0x8c] sm:$0xf0]  ;;  %v1546_v38 = vld [vmem:[#allocation4 + $0x84] sm:$0xf]  ;;  %v2001_v39 = vor.u32 %v1683_v33, %v1615_v32  ;;  %v1666_v40 = vld [vmem:[#allocation4 + $0x90] sm:$0xf0] }
  0x16   :  { %449 = vmatpush.bf16.msra.mxu3 %v1989_v26  ;;  %v1579_v41 = vld [vmem:[#allocation4 + $0x88] sm:$0xf]  ;;  %v1674_v42 = vld [vmem:[#allocation4 + $0x94] sm:$0xf0]  ;;  %v1611_v43 = vld [vmem:[#allocation4 + $0x8c] sm:$0xf]  ;;  %v2004_v45 = vor.u32 %v1658_v37, %v1513_v36  ;;  %v2008_v46 = vor.u32 %v1666_v40, %v1546_v38 }
  0x17   :  { %v1682_v44 = vld [vmem:[#allocation4 + $0x98] sm:$0xf0]  ;;  %v2010_v47 = vor.u32 %v1674_v42, %v1579_v41  ;;  %v1509_v48 = vld [vmem:[#allocation4 + $0x60] sm:$0xf]  ;;  %v1657_v49 = vld [vmem:[#allocation4 + $0x6c] sm:$0xf0] }
  0x18   :  { %147 = vmatpush.bf16.msra.mxu0 %v1992_v30  ;;  %254 = vmatpush.bf16.msra.mxu1 %v1996_v34  ;;  %v1542_v50 = vld [vmem:[#allocation4 + $0x64] sm:$0xf]  ;;  %v2013_v51 = vor.u32 %v1682_v44, %v1611_v43  ;;  %v1665_v52 = vld [vmem:[#allocation4 + $0x70] sm:$0xf0]  ;;  %v1575_v53 = vld [vmem:[#allocation4 + $0x68] sm:$0xf]  ;;  %v2016_v57 = vor.u32 %v1657_v49, %v1509_v48 }
  0x19   :  { %361 = vmatpush.bf16.msra.mxu2 %v1998_v35  ;;  %v1673_v54 = vld [vmem:[#allocation4 + $0x74] sm:$0xf0]  ;;  %v1607_v55 = vld [vmem:[#allocation4 + $0x6c] sm:$0xf]  ;;  %v1681_v56 = vld [vmem:[#allocation4 + $0x78] sm:$0xf0]  ;;  %v2020_v59 = vor.u32 %v1665_v52, %v1542_v50 }
  0x1a   :  { %450 = vmatpush.bf16.msra.mxu3 %v2001_v39  ;;  %v1505_v58 = vld [vmem:[#allocation4 + $0x40] sm:$0xf]  ;;  %v2022_v60 = vor.u32 %v1673_v54, %v1575_v53  ;;  %v1656_v61 = vld [vmem:[#allocation4 + $0x4c] sm:$0xf0]  ;;  %v1538_v62 = vld [vmem:[#allocation4 + $0x44] sm:$0xf]  ;;  %v2028_v0 = vor.u32 %v1681_v56, %v1607_v55 }
  0x1b   :  { %v64_v63 = vld [vmem:[%s2493_s0] sm:$0xff]  ;;  %v1664_v1 = vld [vmem:[#allocation4 + $0x50] sm:$0xf0]  ;;  %v1571_v2 = vld [vmem:[#allocation4 + $0x48] sm:$0xf]  ;;  %v2031_v7 = vor.u32 %v1656_v61, %v1505_v58  ;;  %v1928_v52 = vmov 0.0|0.0  }
  0x1c   :  { %148 = vmatpush.bf16.msra.mxu0 %v2004_v45  ;;  %255 = vmatpush.bf16.msra.mxu1 %v2008_v46  ;;  %v1672_v3 = vld [vmem:[#allocation4 + $0x54] sm:$0xf0]  ;;  %v1603_v5 = vld [vmem:[#allocation4 + $0x4c] sm:$0xf]  ;;  %v1680_v6 = vld [vmem:[#allocation4 + $0x58] sm:$0xf0]  ;;  %v2035_v12 = vor.u32 %v1664_v1, %v1538_v62 }
  0x1d   :  { %362 = vmatpush.bf16.msra.mxu2 %v2010_v47  ;;  %69 = vperm.xlu0 %1695, %v64_v63   ;;  %v1501_v10 = vld [vmem:[#allocation4 + $0x20] sm:$0xf]  ;;  %v1655_v11 = vld [vmem:[#allocation4 + $0x2c] sm:$0xf0]  ;;  %v2037_v14 = vor.u32 %v1672_v3, %v1571_v2  ;;  %v1534_v15 = vld [vmem:[#allocation4 + $0x24] sm:$0xf]  ;;  %v2040_v20 = vor.u32 %v1680_v6, %v1603_v5 }
  0x1e   :  { %451 = vmatpush.bf16.msra.mxu3 %v2013_v51  ;;  %v1663_v16 = vld [vmem:[#allocation4 + $0x30] sm:$0xf0]  ;;  %v1567_v19 = vld [vmem:[#allocation4 + $0x28] sm:$0xf]  ;;  %v1671_v21 = vld [vmem:[#allocation4 + $0x34] sm:$0xf0]  ;;  %v2046_v29 = vor.u32 %v1655_v11, %v1501_v10 }
  0x1f   :  { %v1599_v23 = vld [vmem:[#allocation4 + $0x2c] sm:$0xf]  ;;  %v1679_v24 = vld [vmem:[#allocation4 + $0x38] sm:$0xf0]  ;;  %v1497_v25 = vld [vmem:[#allocation4] sm:$0xf]  ;;  %v2050_v33 = vor.u32 %v1663_v16, %v1534_v15  ;;  %v2052_v36 = vor.u32 %v1671_v21, %v1567_v19 }
  0x20   :  { %149 = vmatpush.bf16.msra.mxu0 %v2016_v57  ;;  %256 = vmatpush.bf16.msra.mxu1 %v2020_v59  ;;  %v1654_v27 = vld [vmem:[#allocation4 + $0xc] sm:$0xf0]  ;;  %v1626_v28 = vld [vmem:[%s2493_s0 + $0x8] sm:$0xff]  ;;  %v1530_v31 = vld [vmem:[#allocation4 + $0x4] sm:$0xf]  ;;  %v2055_v37 = vor.u32 %v1679_v24, %v1599_v23  ;;  %s1482_s7 = sshll.u32 %s1929_s30, 4  ;;  %s1483_s7 = int_to_ptr.vmem [resolvable:$true] %s1482_s7 }
  0x21   :  { %363 = vmatpush.bf16.msra.mxu2 %v2022_v60  ;;  %v1662_v32 = vld [vmem:[#allocation4 + $0x10] sm:$0xf0]  ;;  %v1563_v38 = vld [vmem:[#allocation4 + $0x8] sm:$0xf]  ;;  %v1670_v40 = vld [vmem:[#allocation4 + $0x14] sm:$0xf0]  ;;  %v2058_v43 = vor.u32 %v1654_v27, %v1497_v25 }
  0x22   :  { %452 = vmatpush.bf16.msra.mxu3 %v2028_v0  ;;  %v1595_v41 = vld [vmem:[#allocation4 + $0xc] sm:$0xf]  ;;  %v1678_v42 = vld [vmem:[#allocation4 + $0x18] sm:$0xf0]  ;;  %v2062_v44 = vor.u32 %v1662_v32, %v1530_v31  ;;  %v2064_v48 = vor.u32 %v1670_v40, %v1563_v38  ;;  %v1646_v50 = vld [vmem:[%s2493_s0 + $0x30] sm:$0xff]  ;;  %s1484_s10 = sshll.u32 %s2499_s6, 4  ;;  %s1485_s10 = int_to_ptr.hbm [resolvable:$true] %s1484_s10 }
  0x23   :  { %v2067_v49 = vor.u32 %v1678_v42, %v1595_v41  ;;  %v2143_v53 = vld [vmem:[%s2494_s1] ss:$0 sm:$0xff]  ;;  %v2148_v54 = vld [vmem:[%s2494_s1 + $0x1] ss:$0 sm:$0xff]  ;;  %v2167_v2 = vld [vmem:[%s2494_s1 + $0x3] ss:$0 sm:$0xff] }
  0x24   :  { %150 = vmatpush.bf16.msra.mxu0 %v2031_v7  ;;  %257 = vmatpush.bf16.msra.mxu1 %v2035_v12  ;;  %v2154_v58 = vld [vmem:[%s2495_s2] ss:$0 sm:$0xff]  ;;  %v2160_v62 = vld [vmem:[%s2495_s2 + $0x1] ss:$0 sm:$0xff]  ;;  %v2173_v16 = vld [vmem:[%s2495_s2 + $0x3] ss:$0 sm:$0xff] }
  0x25   :  { %364 = vmatpush.bf16.msra.mxu2 %v2037_v14  ;;  %491 = vperm.xlu0 %1695, %v1626_v28   ;;  %v2179_v31 = vld [vmem:[%s2494_s1 + $0x2] ss:$0 sm:$0xff] }
  0x26   :  { %453 = vmatpush.bf16.msra.mxu3 %v2040_v20  ;;  %2504 = vst [vmem:[#allocation13_spill] sm:$0xff] %v2179_v31 }
  0x28   :  { %151 = vmatpush.bf16.msra.mxu0 %v2046_v29  ;;  %258 = vmatpush.bf16.msra.mxu1 %v2050_v33 }
  0x29   :  { %365 = vmatpush.bf16.msra.mxu2 %v2052_v36 }
  0x2a   :  { %454 = vmatpush.bf16.msra.mxu3 %v2055_v37 }
  0x2c   :  { %152 = vmatpush.bf16.msra.mxu0 %v2058_v43  ;;  %259 = vmatpush.bf16.msra.mxu1 %v2062_v44 }
  0x2d   :  { %366 = vmatpush.bf16.msra.mxu2 %v2064_v48  ;;  %1166 = vperm.xlu0 %1695, %v1646_v50  }
  0x2e   :  { %455 = vmatpush.bf16.msra.mxu3 %v2067_v49 }
  0x2f   :  { %153 = vmatmul.bf16.vlgmr.msra.gmra.mxu0 %v1928_v52  ;;  %260 = vmatmul.bf16.vlgmr.msra.gmra.mxu1 %v1928_v52 }
  0x30   :  { %531 = vmatpush.bf16.msrb.mxu1 %v1973_v8  ;;  %367 = vmatmul.bf16.vlgmr.msra.gmra.mxu2 %v1928_v52 }
  0x31   :  { %456 = vmatmul.bf16.vlgmr.msra.gmra.mxu3 %v1928_v52  ;;  %496 = vmatpush.bf16.msrb.mxu0 %v1971_v4  ;;  %v2185_v52 = vld [vmem:[%s2495_s2 + $0x2] ss:$0 sm:$0xff] }
  0x32   :  { %566 = vmatpush.bf16.msrb.mxu2 %v1975_v9  ;;  %583 = vmatpush.bf16.msrb.mxu3 %v1978_v13  ;;  %2505 = vst [vmem:[#allocation14_spill] sm:$0xff] %v2185_v52 }
  0x34   :  { %532 = vmatpush.bf16.msrb.mxu1 %v1984_v18 }
  0x35   :  { %497 = vmatpush.bf16.msrb.mxu0 %v1982_v17 }
  0x36   :  { %567 = vmatpush.bf16.msrb.mxu2 %v1987_v22  ;;  %584 = vmatpush.bf16.msrb.mxu3 %v1989_v26 }
  0x38   :  { %533 = vmatpush.bf16.msrb.mxu1 %v1996_v34 }
  0x39   :  { %498 = vmatpush.bf16.msrb.mxu0 %v1992_v30 }
  0x3a   :  { %568 = vmatpush.bf16.msrb.mxu2 %v1998_v35  ;;  %585 = vmatpush.bf16.msrb.mxu3 %v2001_v39 }
  0x3c   :  { %534 = vmatpush.bf16.msrb.mxu1 %v2008_v46 }
  0x3d   :  { %499 = vmatpush.bf16.msrb.mxu0 %v2004_v45 }
  0x3e   :  { %569 = vmatpush.bf16.msrb.mxu2 %v2010_v47  ;;  %586 = vmatpush.bf16.msrb.mxu3 %v2013_v51 }
  0x40   :  { %535 = vmatpush.bf16.msrb.mxu1 %v2020_v59 }
  0x41   :  { %500 = vmatpush.bf16.msrb.mxu0 %v2016_v57 }
  0x42   :  { %570 = vmatpush.bf16.msrb.mxu2 %v2022_v60  ;;  %587 = vmatpush.bf16.msrb.mxu3 %v2028_v0 }
  0x44   :  { %536 = vmatpush.bf16.msrb.mxu1 %v2035_v12 }
  0x45   :  { %501 = vmatpush.bf16.msrb.mxu0 %v2031_v7 }
  0x46   :  { %571 = vmatpush.bf16.msrb.mxu2 %v2037_v14  ;;  %588 = vmatpush.bf16.msrb.mxu3 %v2040_v20 }
  0x48   :  { %537 = vmatpush.bf16.msrb.mxu1 %v2050_v33 }
  0x49   :  { %502 = vmatpush.bf16.msrb.mxu0 %v2046_v29 }
  0x4a   :  { %572 = vmatpush.bf16.msrb.mxu2 %v2052_v36  ;;  %589 = vmatpush.bf16.msrb.mxu3 %v2055_v37 }
  0x4c   :  { %538 = vmatpush.bf16.msrb.mxu1 %v2062_v44 }
  0x4d   :  { %503 = vmatpush.bf16.msrb.mxu0 %v2058_v43 }
  0x4e   :  { %573 = vmatpush.bf16.msrb.mxu2 %v2064_v48  ;;  %590 = vmatpush.bf16.msrb.mxu3 %v2067_v49 }
  0x50   :  { %666 = vmatpush.bf16.msra.mxu1 %v1973_v8 }
  0x51   :  { %631 = vmatpush.bf16.msra.mxu0 %v1971_v4 }
  0x52   :  { %701 = vmatpush.bf16.msra.mxu2 %v1975_v9  ;;  %718 = vmatpush.bf16.msra.mxu3 %v1978_v13 }
  0x54   :  { %667 = vmatpush.bf16.msra.mxu1 %v1984_v18 }
  0x55   :  { %632 = vmatpush.bf16.msra.mxu0 %v1982_v17 }
  0x56   :  { %702 = vmatpush.bf16.msra.mxu2 %v1987_v22  ;;  %719 = vmatpush.bf16.msra.mxu3 %v1989_v26 }
  0x58   :  { %668 = vmatpush.bf16.msra.mxu1 %v1996_v34 }
  0x59   :  { %633 = vmatpush.bf16.msra.mxu0 %v1992_v30 }
  0x5a   :  { %703 = vmatpush.bf16.msra.mxu2 %v1998_v35  ;;  %720 = vmatpush.bf16.msra.mxu3 %v2001_v39 }
  0x5c   :  { %669 = vmatpush.bf16.msra.mxu1 %v2008_v46 }
  0x5d   :  { %634 = vmatpush.bf16.msra.mxu0 %v2004_v45 }
  0x5e   :  { %704 = vmatpush.bf16.msra.mxu2 %v2010_v47  ;;  %721 = vmatpush.bf16.msra.mxu3 %v2013_v51 }
  0x60   :  { %670 = vmatpush.bf16.msra.mxu1 %v2020_v59 }
  0x61   :  { %635 = vmatpush.bf16.msra.mxu0 %v2016_v57 }
  0x62   :  { %705 = vmatpush.bf16.msra.mxu2 %v2022_v60  ;;  %722 = vmatpush.bf16.msra.mxu3 %v2028_v0 }
  0x64   :  { %671 = vmatpush.bf16.msra.mxu1 %v2035_v12 }
  0x65   :  { %636 = vmatpush.bf16.msra.mxu0 %v2031_v7 }
  0x66   :  { %706 = vmatpush.bf16.msra.mxu2 %v2037_v14  ;;  %723 = vmatpush.bf16.msra.mxu3 %v2040_v20 }
  0x68   :  { %672 = vmatpush.bf16.msra.mxu1 %v2050_v33 }
  0x69   :  { %637 = vmatpush.bf16.msra.mxu0 %v2046_v29 }
  0x6a   :  { %707 = vmatpush.bf16.msra.mxu2 %v2052_v36  ;;  %724 = vmatpush.bf16.msra.mxu3 %v2055_v37 }
  0x6c   :  { %673 = vmatpush.bf16.msra.mxu1 %v2062_v44 }
  0x6d   :  { %638 = vmatpush.bf16.msra.mxu0 %v2058_v43 }
  0x6e   :  { %708 = vmatpush.bf16.msra.mxu2 %v2064_v48  ;;  %725 = vmatpush.bf16.msra.mxu3 %v2067_v49 }
  0x8f   :  { %v70_v55 = vpop.permute.xlu0 %69 }
  0x90   :  { %v75_v56 = vmul.f32 %v2143_v53, %v70_v55  ;;  %v182_v61 = vmul.f32 %v2148_v54, %v70_v55  ;;  %v378_v15 = vmul.f32 %v2167_v2, %v70_v55  ;;  %v289_v50 = vmul.f32 %v2179_v31, %v70_v55 }
  0x92   :  { %v80_v63 = vadd.f32 %v2154_v58, %v75_v56  ;;  %v187_v1 = vadd.f32 %v2160_v62, %v182_v61  ;;  %v383_v23 = vadd.f32 %v2173_v16, %v378_v15 }
  0xac   :  { %v154_v3 = vpop.f32.mrf.mxu0  ;;  %v261_v6 = vpop.f32.mrf.mxu1 }
  0xad   :  { %v158_v5 = vadd.f32 %v154_v3, %v80_v63  ;;  %v265_v10 = vadd.f32 %v261_v6, %v187_v1  ;;  %v294_v63 = vadd.f32 %v2185_v52, %v289_v50 }
  0xaf   :  { %v1527_v11 = vmul.f32 -1.442695, %v158_v5  ;;  %v1560_v19 = vmul.f32 -1.442695, %v265_v10 }
  0xb1   :  { %1707 = vpow2.f32 %v1527_v11 }
  0xb2   :  { %1709 = vpow2.f32 %v1560_v19 }
  0xb3   :  { %v368_v21 = vpop.f32.mrf.mxu2 }
  0xb4   :  { %v457_v24 = vpop.f32.mrf.mxu3  ;;  %v156_v25 = vpop.f32.mrf.mxu0  ;;  %v372_v5 = vadd.f32 %v368_v21, %v294_v63 }
  0xb5   :  { %v461_v27 = vadd.f32 %v457_v24, %v383_v23  ;;  %v263_v28 = vpop.f32.mrf.mxu1 }
  0xb7   :  { %v1708_v32 = vpop.eup %1707  ;;  %v1625_v38 = vmul.f32 -1.442695, %v461_v27 }
  0xb8   :  { %v1710_v40 = vpop.eup %1709  ;;  %v162_v41 = vadd.f32 1.0, %v1708_v32 }
  0xb9   :  { %v269_v42 = vadd.f32 1.0, %v1710_v40  ;;  %1711 = vpow2.f32 %v1625_v38 }
  0xba   :  { %1713 = vrcp.f32 %v162_v41  ;;  %v174_v23 = vand.u32 2147483648, %v162_v41  ;;  %v172_v27 = vand.u32 2147483647, %v162_v41  ;;  %vm168_vm2 = vweird.f32 %v162_v41 }
  0xbb   :  { %1715 = vrcp.f32 %v269_v42  ;;  %v370_v56 = vpop.f32.mrf.mxu2  ;;  %v281_v24 = vand.u32 2147483648, %v269_v42  ;;  %v279_v32 = vand.u32 2147483647, %v269_v42  ;;  %vm275_vm3 = vweird.f32 %v269_v42 }
  0xbc   :  { %v459_v61 = vpop.f32.mrf.mxu3  ;;  %v175_v21 = vor.u32 1.1754944e-38, %v174_v23  ;;  %vm173_vm5 = vcmp.eq.f32.partialorder %v172_v27, 8.507059e+37 }
  0xbd   :  { %v282_v56 = vor.u32 1.1754944e-38, %v281_v24  ;;  %vm280_vm7 = vcmp.eq.f32.partialorder %v279_v32, 8.507059e+37 }
  0xbf   :  { %v1712_v1 = vpop.eup %1711 }
  0xc0   :  { %v1714_v3 = vpop.eup %1713  ;;  %v465_v6 = vadd.f32 1.0, %v1712_v1 }
  0xc1   :  { %v1716_v10 = vpop.eup %1715  ;;  %v164_v11 = vmul.f32 %v1714_v3, %v162_v41  ;;  %vm169_vm0 = vweird.f32 %v1714_v3 }
  0xc2   :  { %v271_v15 = vmul.f32 %v1716_v10, %v269_v42  ;;  %1717 = vrcp.f32 %v465_v6  ;;  %vm276_vm1 = vweird.f32 %v1716_v10  ;;  %vm170_vm4 = vmor %vm168_vm2, %vm169_vm0  ;;  %v477_v23 = vand.u32 2147483648, %v465_v6 }
  0xc3   :  { %v165_v19 = vsub.f32 1.0, %v164_v11  ;;  %1719 = vtanh.f32 %v372_v5  ;;  %vm277_vm6 = vmor %vm275_vm3, %vm276_vm1  ;;  %vm471_vm9 = vweird.f32 %v465_v6 }
  0xc4   :  { %v272_v55 = vsub.f32 1.0, %v271_v15  ;;  %v478_v27 = vor.u32 1.1754944e-38, %v477_v23 }
  0xc5   :  { %v166_v25 = vmul.f32 %v1714_v3, %v165_v19 }
  0xc6   :  { %v273_v28 = vmul.f32 %v1716_v10, %v272_v55 }
  0xc7   :  { %v167_v38 = vadd.f32 %v1714_v3, %v166_v25 }
  0xc8   :  { %v1718_v40 = vpop.eup %1717  ;;  %v274_v50 = vadd.f32 %v1716_v10, %v273_v28 }
  0xc9   :  { %v171_v61 = vsel %vm170_vm4, %v1714_v3, %v167_v38  ;;  %v467_v63 = vmul.f32 %v1718_v40, %v465_v6  ;;  %v1720_v1 = vpop.eup %1719  ;;  %vm472_vm8 = vweird.f32 %v1718_v40  ;;  %v475_v3 = vand.u32 2147483647, %v465_v6 }
  0xca   :  { %v176_v5 = vsel %vm173_vm5, %v175_v21, %v171_v61  ;;  %v278_v11 = vsel %vm277_vm6, %v1716_v10, %v274_v50  ;;  %vm473_vm10 = vmor %vm471_vm9, %vm472_vm8 }
  0xcb   :  { %v283_v15 = vsel %vm280_vm7, %v282_v56, %v278_v11  ;;  %v482_v19 = vmul.f32 %v1720_v1, %v176_v5  ;;  %v468_v55 = vsub.f32 1.0, %v467_v63  ;;  %vm476_vm11 = vcmp.eq.f32.partialorder %v475_v3, 8.507059e+37 }
  0xcc   :  { %v481_v52 = vmul.f32 0.0, %v283_v15 }
  0xcd   :  { %v469_v25 = vmul.f32 %v1718_v40, %v468_v55 }
  0xce   :  { %v2188_v41 = vadd.f32 %v482_v19, %v481_v52  ;;  %v492_v52 = vpop.permute.xlu0 %491  ;;  %v1630_v19 = vld [vmem:[%s2493_s0 + $0x10] sm:$0xff] }
  0xcf   :  { %v470_v42 = vadd.f32 %v1718_v40, %v469_v25  ;;  %v494_v6 = vmul.f32 %v2143_v53, %v492_v52  ;;  %v581_v5 = vmul.f32 %v2167_v2, %v492_v52  ;;  %626 = vperm.xlu1 %1696, %v1630_v19  }
  0xd0   :  { %1721 = vtanh.f32 %v2188_v41 }
  0xd1   :  { %v474_v24 = vsel %vm473_vm10, %v1718_v40, %v470_v42  ;;  %v529_v40 = vmul.f32 %v2148_v54, %v492_v52  ;;  %v495_v21 = vadd.f32 %v2154_v58, %v494_v6  ;;  %v582_v55 = vadd.f32 %v2173_v16, %v581_v5 }
  0xd2   :  { %v479_v28 = vsel %vm476_vm11, %v478_v27, %v474_v24 }
  0xd3   :  { %v530_v50 = vadd.f32 %v2160_v62, %v529_v40  ;;  %v564_v40 = vmul.f32 %v2179_v31, %v492_v52 }
  0xd6   :  { %v1722_v10 = vpop.eup %1721 }
  0xd7   :  { %v485_v32 = vmul.f32 %v1722_v10, %v479_v28  ;;  %v1634_v10 = vld [vmem:[%s2493_s0 + $0x18] sm:$0xff] }
  0xd8   :  { %761 = vperm.xlu1 %1696, %v1634_v10  }
  0xd9   :  { %v488_v38 = vpack.c.bf16 %v485_v32, %v485_v32 }
  0xdb   :  { %504 = vmatmul.bf16.vlgmr.msrb.gmra.mxu0 %v488_v38  ;;  %539 = vmatmul.bf16.vlgmr.msrb.gmra.mxu1 %v488_v38 }
  0xdc   :  { %574 = vmatmul.bf16.vlgmr.msrb.gmra.mxu2 %v488_v38  ;;  %591 = vmatmul.bf16.vlgmr.msrb.gmra.mxu3 %v488_v38 }
  0xdd   :  { %766 = vmatpush.bf16.msrb.mxu0 %v1971_v4  ;;  %801 = vmatpush.bf16.msrb.mxu1 %v1973_v8 }
  0xde   :  { %836 = vmatpush.bf16.msrb.mxu2 %v1975_v9  ;;  %853 = vmatpush.bf16.msrb.mxu3 %v1978_v13 }
  0xe1   :  { %767 = vmatpush.bf16.msrb.mxu0 %v1982_v17  ;;  %802 = vmatpush.bf16.msrb.mxu1 %v1984_v18 }
  0xe2   :  { %837 = vmatpush.bf16.msrb.mxu2 %v1987_v22  ;;  %854 = vmatpush.bf16.msrb.mxu3 %v1989_v26 }
  0xe5   :  { %768 = vmatpush.bf16.msrb.mxu0 %v1992_v30  ;;  %803 = vmatpush.bf16.msrb.mxu1 %v1996_v34 }
  0xe6   :  { %838 = vmatpush.bf16.msrb.mxu2 %v1998_v35  ;;  %855 = vmatpush.bf16.msrb.mxu3 %v2001_v39 }
  0xe9   :  { %769 = vmatpush.bf16.msrb.mxu0 %v2004_v45  ;;  %804 = vmatpush.bf16.msrb.mxu1 %v2008_v46 }
  0xea   :  { %839 = vmatpush.bf16.msrb.mxu2 %v2010_v47  ;;  %856 = vmatpush.bf16.msrb.mxu3 %v2013_v51 }
  0xed   :  { %770 = vmatpush.bf16.msrb.mxu0 %v2016_v57  ;;  %805 = vmatpush.bf16.msrb.mxu1 %v2020_v59 }
  0xee   :  { %840 = vmatpush.bf16.msrb.mxu2 %v2022_v60  ;;  %857 = vmatpush.bf16.msrb.mxu3 %v2028_v0 }
  0xf1   :  { %771 = vmatpush.bf16.msrb.mxu0 %v2031_v7  ;;  %806 = vmatpush.bf16.msrb.mxu1 %v2035_v12 }
  0xf2   :  { %841 = vmatpush.bf16.msrb.mxu2 %v2037_v14  ;;  %858 = vmatpush.bf16.msrb.mxu3 %v2040_v20 }
  0xf5   :  { %772 = vmatpush.bf16.msrb.mxu0 %v2046_v29  ;;  %807 = vmatpush.bf16.msrb.mxu1 %v2050_v33 }
  0xf6   :  { %842 = vmatpush.bf16.msrb.mxu2 %v2052_v36  ;;  %859 = vmatpush.bf16.msrb.mxu3 %v2055_v37 }
  0xf9   :  { %773 = vmatpush.bf16.msrb.mxu0 %v2058_v43  ;;  %808 = vmatpush.bf16.msrb.mxu1 %v2062_v44 }
  0xfa   :  { %843 = vmatpush.bf16.msrb.mxu2 %v2064_v48  ;;  %860 = vmatpush.bf16.msrb.mxu3 %v2067_v49 }
 0x158   :  { %v505_v56 = vpop.f32.mrf.mxu0  ;;  %v540_v61 = vpop.f32.mrf.mxu1 }
 0x159   :  { %v509_v63 = vadd.f32 %v505_v56, %v495_v21  ;;  %v544_v1 = vadd.f32 %v540_v61, %v530_v50  ;;  %v2506_v61 = vld [vmem:[#allocation14_spill] sm:$0xff] }
 0x15b   :  { %v1627_v11 = vmul.f32 -1.442695, %v509_v63  ;;  %v1628_v15 = vmul.f32 -1.442695, %v544_v1  ;;  %v565_v63 = vadd.f32 %v2506_v61, %v564_v40  ;;  %v1650_v1 = vld [vmem:[%s2493_s0 + $0x38] sm:$0xff] }
 0x15c   :  { %1301 = vperm.xlu1 %1696, %v1650_v1  }
 0x15d   :  { %1723 = vpow2.f32 %v1627_v11 }
 0x15e   :  { %1725 = vpow2.f32 %v1628_v15 }
 0x15f   :  { %v575_v25 = vpop.f32.mrf.mxu2  ;;  %v592_v42 = vpop.f32.mrf.mxu3 }
 0x160   :  { %v596_v23 = vadd.f32 %v592_v42, %v582_v55  ;;  %v507_v3 = vpop.f32.mrf.mxu0  ;;  %v542_v24 = vpop.f32.mrf.mxu1  ;;  %v579_v15 = vadd.f32 %v575_v25, %v565_v63 }
 0x162   :  { %v1629_v27 = vmul.f32 -1.442695, %v596_v23 }
 0x163   :  { %v1724_v28 = vpop.eup %1723 }
 0x164   :  { %v1726_v32 = vpop.eup %1725  ;;  %v513_v38 = vadd.f32 1.0, %v1724_v28  ;;  %1727 = vpow2.f32 %v1629_v27 }
 0x165   :  { %v548_v6 = vadd.f32 1.0, %v1726_v32 }
 0x166   :  { %1729 = vrcp.f32 %v513_v38  ;;  %v525_v3 = vand.u32 2147483648, %v513_v38  ;;  %v523_v10 = vand.u32 2147483647, %v513_v38  ;;  %vm519_vm14 = vweird.f32 %v513_v38 }
 0x167   :  { %1731 = vrcp.f32 %v548_v6  ;;  %v577_v21 = vpop.f32.mrf.mxu2  ;;  %v594_v50 = vpop.f32.mrf.mxu3  ;;  %v560_v24 = vand.u32 2147483648, %v548_v6  ;;  %v558_v32 = vand.u32 2147483647, %v548_v6  ;;  %vm554_vm15 = vweird.f32 %v548_v6 }
 0x168   :  { %v526_v25 = vor.u32 1.1754944e-38, %v525_v3  ;;  %vm524_vm2 = vcmp.eq.f32.partialorder %v523_v10, 8.507059e+37 }
 0x169   :  { %v561_v63 = vor.u32 1.1754944e-38, %v560_v24  ;;  %vm559_vm3 = vcmp.eq.f32.partialorder %v558_v32, 8.507059e+37 }
 0x16a   :  { %v1728_v56 = vpop.eup %1727 }
 0x16b   :  { %v600_v5 = vadd.f32 1.0, %v1728_v56 }
 0x16c   :  { %v1730_v11 = vpop.eup %1729 }
 0x16d   :  { %v1732_v19 = vpop.eup %1731  ;;  %v515_v55 = vmul.f32 %v1730_v11, %v513_v38  ;;  %1733 = vrcp.f32 %v600_v5  ;;  %vm520_vm12 = vweird.f32 %v1730_v11  ;;  %v612_v3 = vand.u32 2147483648, %v600_v5 }
 0x16e   :  { %v550_v42 = vmul.f32 %v1732_v19, %v548_v6  ;;  %1735 = vtanh.f32 %v579_v15  ;;  %vm555_vm13 = vweird.f32 %v1732_v19  ;;  %vm521_vm0 = vmor %vm519_vm14, %vm520_vm12  ;;  %vm606_vm5 = vweird.f32 %v600_v5 }
 0x16f   :  { %v516_v23 = vsub.f32 1.0, %v515_v55  ;;  %vm556_vm1 = vmor %vm554_vm15, %vm555_vm13  ;;  %v613_v10 = vor.u32 1.1754944e-38, %v612_v3 }
 0x170   :  { %v551_v52 = vsub.f32 1.0, %v550_v42 }
 0x171   :  { %v517_v27 = vmul.f32 %v1730_v11, %v516_v23 }
 0x172   :  { %v552_v28 = vmul.f32 %v1732_v19, %v551_v52 }
 0x173   :  { %v1734_v40 = vpop.eup %1733  ;;  %v518_v21 = vadd.f32 %v1730_v11, %v517_v27 }
 0x174   :  { %v553_v50 = vadd.f32 %v1732_v19, %v552_v28  ;;  %v602_v56 = vmul.f32 %v1734_v40, %v600_v5  ;;  %v1736_v15 = vpop.eup %1735  ;;  %vm607_vm4 = vweird.f32 %v1734_v40 }
 0x175   :  { %v522_v1 = vsel %vm521_vm0, %v1730_v11, %v518_v21  ;;  %v610_v11 = vand.u32 2147483647, %v600_v5  ;;  %vm608_vm6 = vmor %vm606_vm5, %vm607_vm4 }
 0x176   :  { %v527_v55 = vsel %vm524_vm2, %v526_v25, %v522_v1  ;;  %v557_v42 = vsel %vm556_vm1, %v1732_v19, %v553_v50  ;;  %v603_v23 = vsub.f32 1.0, %v602_v56 }
 0x177   :  { %v562_v52 = vsel %vm559_vm3, %v561_v63, %v557_v42  ;;  %v617_v61 = vmul.f32 %v1736_v15, %v527_v55  ;;  %vm611_vm7 = vcmp.eq.f32.partialorder %v610_v11, 8.507059e+37 }
 0x178   :  { %v616_v31 = vmul.f32 %v562_v52, %v2188_v41  ;;  %v604_v27 = vmul.f32 %v1734_v40, %v603_v23 }
 0x17a   :  { %v2241_v38 = vadd.f32 %v617_v61, %v616_v31  ;;  %v605_v6 = vadd.f32 %v1734_v40, %v604_v27  ;;  %v627_v31 = vpop.permute.xlu1 %626 }
 0x17b   :  { %v629_v41 = vmul.f32 %v2143_v53, %v627_v31  ;;  %v664_v61 = vmul.f32 %v2148_v54, %v627_v31  ;;  %v716_v1 = vmul.f32 %v2167_v2, %v627_v31 }
 0x17c   :  { %1737 = vtanh.f32 %v2241_v38  ;;  %v609_v24 = vsel %vm608_vm6, %v1734_v40, %v605_v6 }
 0x17d   :  { %v614_v28 = vsel %vm611_vm7, %v613_v10, %v609_v24  ;;  %v630_v5 = vadd.f32 %v2154_v58, %v629_v41  ;;  %v665_v40 = vadd.f32 %v2160_v62, %v664_v61  ;;  %v717_v42 = vadd.f32 %v2173_v16, %v716_v1 }
 0x182   :  { %v1738_v19 = vpop.eup %1737 }
 0x183   :  { %v620_v32 = vmul.f32 %v1738_v19, %v614_v28 }
 0x185   :  { %v623_v21 = vpack.c.bf16 %v620_v32, %v620_v32  ;;  %v2507_v32 = vld [vmem:[#allocation13_spill] sm:$0xff] }
 0x187   :  { %639 = vmatmul.bf16.vlgmr.msra.gmra.mxu0 %v623_v21  ;;  %674 = vmatmul.bf16.vlgmr.msra.gmra.mxu1 %v623_v21 }
 0x188   :  { %709 = vmatmul.bf16.vlgmr.msra.gmra.mxu2 %v623_v21  ;;  %726 = vmatmul.bf16.vlgmr.msra.gmra.mxu3 %v623_v21  ;;  %v699_v21 = vmul.f32 %v2507_v32, %v627_v31 }
 0x189   :  { %901 = vmatpush.bf16.msra.mxu0 %v1971_v4  ;;  %936 = vmatpush.bf16.msra.mxu1 %v1973_v8 }
 0x18a   :  { %971 = vmatpush.bf16.msra.mxu2 %v1975_v9  ;;  %988 = vmatpush.bf16.msra.mxu3 %v1978_v13 }
 0x18d   :  { %902 = vmatpush.bf16.msra.mxu0 %v1982_v17  ;;  %937 = vmatpush.bf16.msra.mxu1 %v1984_v18 }
 0x18e   :  { %972 = vmatpush.bf16.msra.mxu2 %v1987_v22  ;;  %989 = vmatpush.bf16.msra.mxu3 %v1989_v26 }
 0x191   :  { %903 = vmatpush.bf16.msra.mxu0 %v1992_v30  ;;  %938 = vmatpush.bf16.msra.mxu1 %v1996_v34 }
 0x192   :  { %973 = vmatpush.bf16.msra.mxu2 %v1998_v35  ;;  %990 = vmatpush.bf16.msra.mxu3 %v2001_v39 }
 0x195   :  { %904 = vmatpush.bf16.msra.mxu0 %v2004_v45  ;;  %939 = vmatpush.bf16.msra.mxu1 %v2008_v46 }
 0x196   :  { %974 = vmatpush.bf16.msra.mxu2 %v2010_v47  ;;  %991 = vmatpush.bf16.msra.mxu3 %v2013_v51 }
 0x199   :  { %905 = vmatpush.bf16.msra.mxu0 %v2016_v57  ;;  %940 = vmatpush.bf16.msra.mxu1 %v2020_v59 }
 0x19a   :  { %975 = vmatpush.bf16.msra.mxu2 %v2022_v60  ;;  %992 = vmatpush.bf16.msra.mxu3 %v2028_v0 }
 0x19d   :  { %906 = vmatpush.bf16.msra.mxu0 %v2031_v7  ;;  %941 = vmatpush.bf16.msra.mxu1 %v2035_v12 }
 0x19e   :  { %976 = vmatpush.bf16.msra.mxu2 %v2037_v14  ;;  %993 = vmatpush.bf16.msra.mxu3 %v2040_v20 }
 0x1a1   :  { %907 = vmatpush.bf16.msra.mxu0 %v2046_v29  ;;  %942 = vmatpush.bf16.msra.mxu1 %v2050_v33 }
 0x1a2   :  { %977 = vmatpush.bf16.msra.mxu2 %v2052_v36  ;;  %994 = vmatpush.bf16.msra.mxu3 %v2055_v37 }
 0x1a5   :  { %908 = vmatpush.bf16.msra.mxu0 %v2058_v43  ;;  %943 = vmatpush.bf16.msra.mxu1 %v2062_v44 }
 0x1a6   :  { %978 = vmatpush.bf16.msra.mxu2 %v2064_v48  ;;  %995 = vmatpush.bf16.msra.mxu3 %v2067_v49 }
 0x204   :  { %v640_v25 = vpop.f32.mrf.mxu0  ;;  %v675_v50 = vpop.f32.mrf.mxu1 }
 0x205   :  { %v644_v56 = vadd.f32 %v640_v25, %v630_v5  ;;  %v679_v63 = vadd.f32 %v675_v50, %v665_v40  ;;  %v2508_v40 = vld [vmem:[#allocation14_spill] sm:$0xff] }
 0x206   :  { %v700_v25 = vadd.f32 %v2508_v40, %v699_v21 }
 0x207   :  { %v1631_v15 = vmul.f32 -1.442695, %v644_v56  ;;  %v1632_v55 = vmul.f32 -1.442695, %v679_v63 }
 0x209   :  { %1739 = vpow2.f32 %v1631_v15 }
 0x20a   :  { %1741 = vpow2.f32 %v1632_v55 }
 0x20b   :  { %v710_v23 = vpop.f32.mrf.mxu2  ;;  %v727_v52 = vpop.f32.mrf.mxu3 }
 0x20c   :  { %v731_v27 = vadd.f32 %v727_v52, %v717_v42  ;;  %v642_v6 = vpop.f32.mrf.mxu0  ;;  %v677_v3 = vpop.f32.mrf.mxu1  ;;  %v714_v63 = vadd.f32 %v710_v23, %v700_v25 }
 0x20e   :  { %v1633_v11 = vmul.f32 -1.442695, %v731_v27 }
 0x20f   :  { %v1740_v24 = vpop.eup %1739 }
 0x210   :  { %v1742_v10 = vpop.eup %1741  ;;  %v648_v19 = vadd.f32 1.0, %v1740_v24  ;;  %1743 = vpow2.f32 %v1633_v11 }
 0x211   :  { %v683_v28 = vadd.f32 1.0, %v1742_v10 }
 0x212   :  { %1745 = vrcp.f32 %v648_v19  ;;  %v660_v27 = vand.u32 2147483648, %v648_v19  ;;  %v658_v31 = vand.u32 2147483647, %v648_v19  ;;  %vm654_vm10 = vweird.f32 %v648_v19 }
 0x213   :  { %1747 = vrcp.f32 %v683_v28  ;;  %v712_v41 = vpop.f32.mrf.mxu2  ;;  %v729_v61 = vpop.f32.mrf.mxu3  ;;  %v695_v6 = vand.u32 2147483648, %v683_v28  ;;  %v693_v24 = vand.u32 2147483647, %v683_v28  ;;  %vm689_vm11 = vweird.f32 %v683_v28 }
 0x214   :  { %v661_v23 = vor.u32 1.1754944e-38, %v660_v27  ;;  %vm659_vm14 = vcmp.eq.f32.partialorder %v658_v31, 8.507059e+37 }
 0x215   :  { %vm694_vm15 = vcmp.eq.f32.partialorder %v693_v24, 8.507059e+37 }
 0x216   :  { %v1744_v5 = vpop.eup %1743 }
 0x217   :  { %v735_v50 = vadd.f32 1.0, %v1744_v5  ;;  %v696_v5 = vor.u32 1.1754944e-38, %v695_v6 }
 0x218   :  { %v1746_v56 = vpop.eup %1745 }
 0x219   :  { %v1748_v1 = vpop.eup %1747  ;;  %v650_v15 = vmul.f32 %v1746_v56, %v648_v19  ;;  %1749 = vrcp.f32 %v735_v50  ;;  %vm655_vm8 = vweird.f32 %v1746_v56  ;;  %v747_v27 = vand.u32 2147483648, %v735_v50 }
 0x21a   :  { %v685_v55 = vmul.f32 %v1748_v1, %v683_v28  ;;  %1751 = vtanh.f32 %v714_v63  ;;  %vm690_vm9 = vweird.f32 %v1748_v1  ;;  %vm656_vm12 = vmor %vm654_vm10, %vm655_vm8  ;;  %vm741_vm1 = vweird.f32 %v735_v50 }
 0x21b   :  { %v651_v42 = vsub.f32 1.0, %v650_v15  ;;  %vm691_vm13 = vmor %vm689_vm11, %vm690_vm9  ;;  %v748_v31 = vor.u32 1.1754944e-38, %v747_v27 }
 0x21c   :  { %v686_v52 = vsub.f32 1.0, %v685_v55 }
 0x21d   :  { %v652_v3 = vmul.f32 %v1746_v56, %v651_v42 }
 0x21e   :  { %v687_v11 = vmul.f32 %v1748_v1, %v686_v52 }
 0x21f   :  { %v1750_v10 = vpop.eup %1749  ;;  %v653_v21 = vadd.f32 %v1746_v56, %v652_v3 }
 0x220   :  { %v688_v41 = vadd.f32 %v1748_v1, %v687_v11  ;;  %v737_v61 = vmul.f32 %v1750_v10, %v735_v50  ;;  %v1752_v63 = vpop.eup %1751  ;;  %vm742_vm0 = vweird.f32 %v1750_v10 }
 0x221   :  { %v657_v25 = vsel %vm656_vm12, %v1746_v56, %v653_v21  ;;  %v745_v56 = vand.u32 2147483647, %v735_v50  ;;  %vm743_vm2 = vmor %vm741_vm1, %vm742_vm0 }
 0x222   :  { %v662_v15 = vsel %vm659_vm14, %v661_v23, %v657_v25  ;;  %v692_v55 = vsel %vm691_vm13, %v1748_v1, %v688_v41  ;;  %v738_v42 = vsub.f32 1.0, %v737_v61 }
 0x223   :  { %v697_v52 = vsel %vm694_vm15, %v696_v5, %v692_v55  ;;  %v752_v40 = vmul.f32 %v1752_v63, %v662_v15  ;;  %vm746_vm3 = vcmp.eq.f32.partialorder %v745_v56, 8.507059e+37 }
 0x224   :  { %v751_v32 = vmul.f32 %v697_v52, %v2241_v38  ;;  %v739_v3 = vmul.f32 %v1750_v10, %v738_v42  ;;  %v762_v38 = vpop.permute.xlu1 %761 }
 0x225   :  { %v851_v25 = vmul.f32 %v2167_v2, %v762_v38 }
 0x226   :  { %v2285_v19 = vadd.f32 %v752_v40, %v751_v32  ;;  %v740_v28 = vadd.f32 %v1750_v10, %v739_v3  ;;  %v764_v32 = vmul.f32 %v2143_v53, %v762_v38  ;;  %v799_v40 = vmul.f32 %v2148_v54, %v762_v38 }
 0x227   :  { %v852_v55 = vadd.f32 %v2173_v16, %v851_v25 }
 0x228   :  { %1753 = vtanh.f32 %v2285_v19  ;;  %v744_v6 = vsel %vm743_vm2, %v1750_v10, %v740_v28  ;;  %v765_v50 = vadd.f32 %v2154_v58, %v764_v32  ;;  %v800_v10 = vadd.f32 %v2160_v62, %v799_v40 }
 0x229   :  { %v749_v11 = vsel %vm746_vm3, %v748_v31, %v744_v6 }
 0x22e   :  { %v1754_v1 = vpop.eup %1753 }
 0x22f   :  { %v755_v24 = vmul.f32 %v1754_v1, %v749_v11 }
 0x231   :  { %v758_v21 = vpack.c.bf16 %v755_v24, %v755_v24  ;;  %v2509_v24 = vld [vmem:[#allocation13_spill] sm:$0xff] }
 0x233   :  { %774 = vmatmul.bf16.vlgmr.msrb.gmra.mxu0 %v758_v21  ;;  %809 = vmatmul.bf16.vlgmr.msrb.gmra.mxu1 %v758_v21 }
 0x234   :  { %844 = vmatmul.bf16.vlgmr.msrb.gmra.mxu2 %v758_v21  ;;  %861 = vmatmul.bf16.vlgmr.msrb.gmra.mxu3 %v758_v21  ;;  %v834_v21 = vmul.f32 %v2509_v24, %v762_v38  ;;  %v1642_v38 = vld [vmem:[%s2493_s0 + $0x28] sm:$0xff] }
 0x235   :  { %1036 = vmatpush.bf16.msrb.mxu0 %v1971_v4  ;;  %1071 = vmatpush.bf16.msrb.mxu1 %v1973_v8 }
 0x236   :  { %1106 = vmatpush.bf16.msrb.mxu2 %v1975_v9  ;;  %1123 = vmatpush.bf16.msrb.mxu3 %v1978_v13 }
 0x239   :  { %1037 = vmatpush.bf16.msrb.mxu0 %v1982_v17  ;;  %1072 = vmatpush.bf16.msrb.mxu1 %v1984_v18 }
 0x23a   :  { %1107 = vmatpush.bf16.msrb.mxu2 %v1987_v22  ;;  %1124 = vmatpush.bf16.msrb.mxu3 %v1989_v26 }
 0x23d   :  { %1038 = vmatpush.bf16.msrb.mxu0 %v1992_v30  ;;  %1073 = vmatpush.bf16.msrb.mxu1 %v1996_v34 }
 0x23e   :  { %1108 = vmatpush.bf16.msrb.mxu2 %v1998_v35  ;;  %1125 = vmatpush.bf16.msrb.mxu3 %v2001_v39 }
 0x241   :  { %1039 = vmatpush.bf16.msrb.mxu0 %v2004_v45  ;;  %1074 = vmatpush.bf16.msrb.mxu1 %v2008_v46 }
 0x242   :  { %1109 = vmatpush.bf16.msrb.mxu2 %v2010_v47  ;;  %1126 = vmatpush.bf16.msrb.mxu3 %v2013_v51 }
 0x245   :  { %1040 = vmatpush.bf16.msrb.mxu0 %v2016_v57  ;;  %1075 = vmatpush.bf16.msrb.mxu1 %v2020_v59 }
 0x246   :  { %1110 = vmatpush.bf16.msrb.mxu2 %v2022_v60  ;;  %1127 = vmatpush.bf16.msrb.mxu3 %v2028_v0 }
 0x249   :  { %1041 = vmatpush.bf16.msrb.mxu0 %v2031_v7  ;;  %1076 = vmatpush.bf16.msrb.mxu1 %v2035_v12 }
 0x24a   :  { %1111 = vmatpush.bf16.msrb.mxu2 %v2037_v14  ;;  %1128 = vmatpush.bf16.msrb.mxu3 %v2040_v20 }
 0x24d   :  { %1042 = vmatpush.bf16.msrb.mxu0 %v2046_v29  ;;  %1077 = vmatpush.bf16.msrb.mxu1 %v2050_v33 }
 0x24e   :  { %1112 = vmatpush.bf16.msrb.mxu2 %v2052_v36  ;;  %1129 = vmatpush.bf16.msrb.mxu3 %v2055_v37 }
 0x251   :  { %1043 = vmatpush.bf16.msrb.mxu0 %v2058_v43  ;;  %1078 = vmatpush.bf16.msrb.mxu1 %v2062_v44 }
 0x252   :  { %1113 = vmatpush.bf16.msrb.mxu2 %v2064_v48  ;;  %1130 = vmatpush.bf16.msrb.mxu3 %v2067_v49 }
 0x2b0   :  { %v775_v23 = vpop.f32.mrf.mxu0  ;;  %v810_v41 = vpop.f32.mrf.mxu1 }
 0x2b1   :  { %v779_v61 = vadd.f32 %v775_v23, %v765_v50  ;;  %v814_v5 = vadd.f32 %v810_v41, %v800_v10  ;;  %v1638_v50 = vld [vmem:[%s2493_s0 + $0x20] sm:$0xff]  ;;  %v2510_v23 = vld [vmem:[#allocation14_spill] sm:$0xff] }
 0x2b2   :  { %896 = vperm.xlu2 %1697, %v1638_v50   ;;  %v835_v41 = vadd.f32 %v2510_v23, %v834_v21 }
 0x2b3   :  { %v1635_v63 = vmul.f32 -1.442695, %v779_v61  ;;  %v1636_v15 = vmul.f32 -1.442695, %v814_v5 }
 0x2b5   :  { %1755 = vpow2.f32 %v1635_v63 }
 0x2b6   :  { %1757 = vpow2.f32 %v1636_v15 }
 0x2b7   :  { %v845_v42 = vpop.f32.mrf.mxu2  ;;  %v862_v52 = vpop.f32.mrf.mxu3 }
 0x2b8   :  { %v866_v3 = vadd.f32 %v862_v52, %v852_v55  ;;  %v777_v28 = vpop.f32.mrf.mxu0  ;;  %v812_v27 = vpop.f32.mrf.mxu1  ;;  %v849_v25 = vadd.f32 %v845_v42, %v835_v41 }
 0x2ba   :  { %v1637_v56 = vmul.f32 -1.442695, %v866_v3  ;;  %1031 = vperm.xlu2 %1697, %v1642_v38  }
 0x2bb   :  { %v1756_v6 = vpop.eup %1755 }
 0x2bc   :  { %v1758_v31 = vpop.eup %1757  ;;  %v783_v1 = vadd.f32 1.0, %v1756_v6  ;;  %1759 = vpow2.f32 %v1637_v56 }
 0x2bd   :  { %v818_v11 = vadd.f32 1.0, %v1758_v31 }
 0x2be   :  { %1761 = vrcp.f32 %v783_v1  ;;  %v795_v28 = vand.u32 2147483648, %v783_v1  ;;  %v793_v6 = vand.u32 2147483647, %v783_v1  ;;  %vm789_vm6 = vweird.f32 %v783_v1 }
 0x2bf   :  { %1763 = vrcp.f32 %v818_v11  ;;  %v847_v32 = vpop.f32.mrf.mxu2  ;;  %v864_v40 = vpop.f32.mrf.mxu3  ;;  %v830_v27 = vand.u32 2147483648, %v818_v11  ;;  %v828_v42 = vand.u32 2147483647, %v818_v11  ;;  %vm824_vm7 = vweird.f32 %v818_v11 }
 0x2c0   :  { %v796_v40 = vor.u32 1.1754944e-38, %v795_v28  ;;  %vm794_vm10 = vcmp.eq.f32.partialorder %v793_v6, 8.507059e+37 }
 0x2c1   :  { %v831_v41 = vor.u32 1.1754944e-38, %v830_v27  ;;  %vm829_vm11 = vcmp.eq.f32.partialorder %v828_v42, 8.507059e+37 }
 0x2c2   :  { %v1760_v10 = vpop.eup %1759 }
 0x2c3   :  { %v870_v61 = vadd.f32 1.0, %v1760_v10 }
 0x2c4   :  { %v1762_v5 = vpop.eup %1761 }
 0x2c5   :  { %v1764_v63 = vpop.eup %1763  ;;  %v785_v15 = vmul.f32 %v1762_v5, %v783_v1  ;;  %1765 = vrcp.f32 %v870_v61  ;;  %vm790_vm4 = vweird.f32 %v1762_v5  ;;  %v882_v28 = vand.u32 2147483648, %v870_v61 }
 0x2c6   :  { %v820_v55 = vmul.f32 %v1764_v63, %v818_v11  ;;  %1767 = vtanh.f32 %v849_v25  ;;  %vm825_vm5 = vweird.f32 %v1764_v63  ;;  %vm791_vm8 = vmor %vm789_vm6, %vm790_vm4  ;;  %vm876_vm13 = vweird.f32 %v870_v61 }
 0x2c7   :  { %v786_v52 = vsub.f32 1.0, %v785_v15  ;;  %vm826_vm9 = vmor %vm824_vm7, %vm825_vm5  ;;  %v883_v6 = vor.u32 1.1754944e-38, %v882_v28 }
 0x2c8   :  { %v821_v3 = vsub.f32 1.0, %v820_v55 }
 0x2c9   :  { %v787_v56 = vmul.f32 %v1762_v5, %v786_v52 }
 0x2ca   :  { %v822_v31 = vmul.f32 %v1764_v63, %v821_v3 }
 0x2cb   :  { %v1766_v21 = vpop.eup %1765  ;;  %v788_v32 = vadd.f32 %v1762_v5, %v787_v56 }
 0x2cc   :  { %v823_v50 = vadd.f32 %v1764_v63, %v822_v31  ;;  %v872_v10 = vmul.f32 %v1766_v21, %v870_v61  ;;  %v1768_v25 = vpop.eup %1767  ;;  %vm877_vm12 = vweird.f32 %v1766_v21 }
 0x2cd   :  { %v792_v15 = vsel %vm791_vm8, %v1762_v5, %v788_v32  ;;  %v880_v5 = vand.u32 2147483647, %v870_v61  ;;  %vm878_vm14 = vmor %vm876_vm13, %vm877_vm12 }
 0x2ce   :  { %v797_v55 = vsel %vm794_vm10, %v796_v40, %v792_v15  ;;  %v827_v52 = vsel %vm826_vm9, %v1764_v63, %v823_v50  ;;  %v873_v38 = vsub.f32 1.0, %v872_v10 }
 0x2cf   :  { %v832_v3 = vsel %vm829_vm11, %v831_v41, %v827_v52  ;;  %v887_v23 = vmul.f32 %v1768_v25, %v797_v55  ;;  %vm881_vm15 = vcmp.eq.f32.partialorder %v880_v5, 8.507059e+37 }
 0x2d0   :  { %v886_v24 = vmul.f32 %v832_v3, %v2285_v19  ;;  %v874_v56 = vmul.f32 %v1766_v21, %v873_v38 }
 0x2d2   :  { %v2335_v1 = vadd.f32 %v887_v23, %v886_v24  ;;  %v875_v11 = vadd.f32 %v1766_v21, %v874_v56 }
 0x2d4   :  { %1769 = vtanh.f32 %v2335_v1  ;;  %v879_v27 = vsel %vm878_vm14, %v1766_v21, %v875_v11 }
 0x2d5   :  { %v884_v31 = vsel %vm881_vm15, %v883_v6, %v879_v27  ;;  %v2511_v27 = vld [vmem:[#allocation13_spill] sm:$0xff] }
 0x2da   :  { %v1770_v63 = vpop.eup %1769 }
 0x2db   :  { %v890_v42 = vmul.f32 %v1770_v63, %v884_v31 }
 0x2dd   :  { %v893_v32 = vpack.c.bf16 %v890_v42, %v890_v42  ;;  %v2512_v42 = vld [vmem:[#allocation14_spill] sm:$0xff] }
 0x2df   :  { %909 = vmatmul.bf16.vlgmr.msra.gmra.mxu0 %v893_v32  ;;  %944 = vmatmul.bf16.vlgmr.msra.gmra.mxu1 %v893_v32 }
 0x2e0   :  { %979 = vmatmul.bf16.vlgmr.msra.gmra.mxu2 %v893_v32  ;;  %996 = vmatmul.bf16.vlgmr.msra.gmra.mxu3 %v893_v32 }
 0x2e1   :  { %1171 = vmatpush.bf16.msra.mxu0 %v1971_v4  ;;  %1206 = vmatpush.bf16.msra.mxu1 %v1973_v8 }
 0x2e2   :  { %1241 = vmatpush.bf16.msra.mxu2 %v1975_v9  ;;  %1258 = vmatpush.bf16.msra.mxu3 %v1978_v13 }
 0x2e5   :  { %1172 = vmatpush.bf16.msra.mxu0 %v1982_v17  ;;  %1207 = vmatpush.bf16.msra.mxu1 %v1984_v18 }
 0x2e6   :  { %1242 = vmatpush.bf16.msra.mxu2 %v1987_v22  ;;  %1259 = vmatpush.bf16.msra.mxu3 %v1989_v26 }
 0x2e9   :  { %1173 = vmatpush.bf16.msra.mxu0 %v1992_v30  ;;  %1208 = vmatpush.bf16.msra.mxu1 %v1996_v34 }
 0x2ea   :  { %1243 = vmatpush.bf16.msra.mxu2 %v1998_v35  ;;  %1260 = vmatpush.bf16.msra.mxu3 %v2001_v39 }
 0x2ed   :  { %1174 = vmatpush.bf16.msra.mxu0 %v2004_v45  ;;  %1209 = vmatpush.bf16.msra.mxu1 %v2008_v46 }
 0x2ee   :  { %1244 = vmatpush.bf16.msra.mxu2 %v2010_v47  ;;  %1261 = vmatpush.bf16.msra.mxu3 %v2013_v51 }
 0x2f1   :  { %1175 = vmatpush.bf16.msra.mxu0 %v2016_v57  ;;  %1210 = vmatpush.bf16.msra.mxu1 %v2020_v59 }
 0x2f2   :  { %1245 = vmatpush.bf16.msra.mxu2 %v2022_v60  ;;  %1262 = vmatpush.bf16.msra.mxu3 %v2028_v0 }
 0x2f5   :  { %1176 = vmatpush.bf16.msra.mxu0 %v2031_v7  ;;  %1211 = vmatpush.bf16.msra.mxu1 %v2035_v12 }
 0x2f6   :  { %1246 = vmatpush.bf16.msra.mxu2 %v2037_v14  ;;  %1263 = vmatpush.bf16.msra.mxu3 %v2040_v20 }
 0x2f9   :  { %1177 = vmatpush.bf16.msra.mxu0 %v2046_v29  ;;  %1212 = vmatpush.bf16.msra.mxu1 %v2050_v33 }
 0x2fa   :  { %1247 = vmatpush.bf16.msra.mxu2 %v2052_v36  ;;  %1264 = vmatpush.bf16.msra.mxu3 %v2055_v37 }
 0x2fd   :  { %1178 = vmatpush.bf16.msra.mxu0 %v2058_v43  ;;  %1213 = vmatpush.bf16.msra.mxu1 %v2062_v44 }
 0x2fe   :  { %1248 = vmatpush.bf16.msra.mxu2 %v2064_v48  ;;  %1265 = vmatpush.bf16.msra.mxu3 %v2067_v49 }
 0x30c   :  { %v897_v19 = vpop.permute.xlu2 %896 }
 0x30d   :  { %v899_v24 = vmul.f32 %v2143_v53, %v897_v19  ;;  %v934_v23 = vmul.f32 %v2148_v54, %v897_v19  ;;  %v986_v15 = vmul.f32 %v2167_v2, %v897_v19  ;;  %v969_v2 = vmul.f32 %v2511_v27, %v897_v19 }
 0x30f   :  { %v900_v61 = vadd.f32 %v2154_v58, %v899_v24  ;;  %v935_v21 = vadd.f32 %v2160_v62, %v934_v23  ;;  %v987_v52 = vadd.f32 %v2173_v16, %v986_v15  ;;  %v970_v16 = vadd.f32 %v2512_v42, %v969_v2 }
 0x35c   :  { %v910_v40 = vpop.f32.mrf.mxu0  ;;  %v945_v50 = vpop.f32.mrf.mxu1 }
 0x35d   :  { %v914_v10 = vadd.f32 %v910_v40, %v900_v61  ;;  %v949_v41 = vadd.f32 %v945_v50, %v935_v21 }
 0x35f   :  { %v1639_v25 = vmul.f32 -1.442695, %v914_v10  ;;  %v1640_v55 = vmul.f32 -1.442695, %v949_v41 }
 0x361   :  { %1771 = vpow2.f32 %v1639_v25 }
 0x362   :  { %1773 = vpow2.f32 %v1640_v55 }
 0x363   :  { %v980_v38 = vpop.f32.mrf.mxu2  ;;  %v997_v53 = vpop.f32.mrf.mxu3 }
 0x364   :  { %v1001_v3 = vadd.f32 %v997_v53, %v987_v52  ;;  %v912_v54 = vpop.f32.mrf.mxu0  ;;  %v947_v56 = vpop.f32.mrf.mxu1  ;;  %v984_v23 = vadd.f32 %v980_v38, %v970_v16 }
 0x366   :  { %v1641_v58 = vmul.f32 -1.442695, %v1001_v3 }
 0x367   :  { %v1772_v11 = vpop.eup %1771 }
 0x368   :  { %v1774_v62 = vpop.eup %1773  ;;  %v918_v28 = vadd.f32 1.0, %v1772_v11  ;;  %1775 = vpow2.f32 %v1641_v58 }
 0x369   :  { %v953_v5 = vadd.f32 1.0, %v1774_v62 }
 0x36a   :  { %1777 = vrcp.f32 %v918_v28  ;;  %v930_v41 = vand.u32 2147483648, %v918_v28  ;;  %v928_v19 = vand.u32 2147483647, %v918_v28  ;;  %vm924_vm2 = vweird.f32 %v918_v28 }
 0x36b   :  { %1779 = vrcp.f32 %v953_v5  ;;  %v982_v6 = vpop.f32.mrf.mxu2  ;;  %v999_v63 = vpop.f32.mrf.mxu3  ;;  %v965_v15 = vand.u32 2147483648, %v953_v5  ;;  %v963_v52 = vand.u32 2147483647, %v953_v5  ;;  %vm959_vm3 = vweird.f32 %v953_v5 }
 0x36c   :  { %v931_v38 = vor.u32 1.1754944e-38, %v930_v41  ;;  %vm929_vm6 = vcmp.eq.f32.partialorder %v928_v19, 8.507059e+37 }
 0x36d   :  { %v966_v58 = vor.u32 1.1754944e-38, %v965_v15  ;;  %vm964_vm7 = vcmp.eq.f32.partialorder %v963_v52, 8.507059e+37  ;;  %v2459_v15 = vld [vmem:[%s2495_s2 + $0x2] ss:$0 sm:$0xff] }
 0x36e   :  { %v1776_v31 = vpop.eup %1775 }
 0x36f   :  { %v1005_v32 = vadd.f32 1.0, %v1776_v31 }
 0x370   :  { %v1778_v24 = vpop.eup %1777 }
 0x371   :  { %v1780_v61 = vpop.eup %1779  ;;  %v920_v21 = vmul.f32 %v1778_v24, %v918_v28  ;;  %1781 = vrcp.f32 %v1005_v32  ;;  %vm925_vm0 = vweird.f32 %v1778_v24  ;;  %vm1011_vm9 = vweird.f32 %v1005_v32 }
 0x372   :  { %v955_v40 = vmul.f32 %v1780_v61, %v953_v5  ;;  %1783 = vtanh.f32 %v984_v23  ;;  %vm960_vm1 = vweird.f32 %v1780_v61  ;;  %vm926_vm4 = vmor %vm924_vm2, %vm925_vm0  ;;  %v1017_v23 = vand.u32 2147483648, %v1005_v32 }
 0x373   :  { %v921_v50 = vsub.f32 1.0, %v920_v21  ;;  %vm961_vm5 = vmor %vm959_vm3, %vm960_vm1 }
 0x374   :  { %v956_v10 = vsub.f32 1.0, %v955_v40  ;;  %v1018_v40 = vor.u32 1.1754944e-38, %v1017_v23 }
 0x375   :  { %v922_v25 = vmul.f32 %v1778_v24, %v921_v50 }
 0x376   :  { %v957_v55 = vmul.f32 %v1780_v61, %v956_v10 }
 0x377   :  { %v1782_v53 = vpop.eup %1781  ;;  %v923_v3 = vadd.f32 %v1778_v24, %v922_v25 }
 0x378   :  { %v958_v54 = vadd.f32 %v1780_v61, %v957_v55  ;;  %v1007_v56 = vmul.f32 %v1782_v53, %v1005_v32  ;;  %v1784_v62 = vpop.eup %1783  ;;  %vm1012_vm8 = vweird.f32 %v1782_v53 }
 0x379   :  { %v927_v11 = vsel %vm926_vm4, %v1778_v24, %v923_v3  ;;  %v1015_v24 = vand.u32 2147483647, %v1005_v32  ;;  %vm1013_vm10 = vmor %vm1011_vm9, %vm1012_vm8 }
 0x37a   :  { %v932_v27 = vsel %vm929_vm6, %v931_v38, %v927_v11  ;;  %v962_v2 = vsel %vm961_vm5, %v1780_v61, %v958_v54  ;;  %v1008_v6 = vsub.f32 1.0, %v1007_v56 }
 0x37b   :  { %v967_v63 = vsel %vm964_vm7, %v966_v58, %v962_v2  ;;  %v1022_v31 = vmul.f32 %v1784_v62, %v932_v27  ;;  %vm1016_vm11 = vcmp.eq.f32.partialorder %v1015_v24, 8.507059e+37 }
 0x37c   :  { %v1021_v42 = vmul.f32 %v967_v63, %v2335_v1  ;;  %v1009_v16 = vmul.f32 %v1782_v53, %v1008_v6 }
 0x37e   :  { %v2379_v28 = vadd.f32 %v1022_v31, %v1021_v42  ;;  %v1010_v5 = vadd.f32 %v1782_v53, %v1009_v16 }
 0x380   :  { %1785 = vtanh.f32 %v2379_v28  ;;  %v1014_v21 = vsel %vm1013_vm10, %v1782_v53, %v1010_v5 }
 0x381   :  { %v1019_v50 = vsel %vm1016_vm11, %v1018_v40, %v1014_v21 }
 0x386   :  { %v1786_v61 = vpop.eup %1785 }
 0x387   :  { %v1025_v10 = vmul.f32 %v1786_v61, %v1019_v50 }
 0x389   :  { %v1028_v41 = vpack.c.bf16 %v1025_v10, %v1025_v10 }
 0x38b   :  { %1044 = vmatmul.bf16.vlgmr.msrb.gmra.mxu0 %v1028_v41  ;;  %1079 = vmatmul.bf16.vlgmr.msrb.gmra.mxu1 %v1028_v41 }
 0x38c   :  { %1114 = vmatmul.bf16.vlgmr.msrb.gmra.mxu2 %v1028_v41  ;;  %1131 = vmatmul.bf16.vlgmr.msrb.gmra.mxu3 %v1028_v41 }
 0x38d   :  { %1306 = vmatpush.bf16.msrb.mxu0 %v1971_v4  ;;  %1341 = vmatpush.bf16.msrb.mxu1 %v1973_v8  ;;  %v1032_v4 = vpop.permute.xlu2 %1031  ;;  %v2417_v8 = vld [vmem:[%s2494_s1] ss:$0 sm:$0xff] }
 0x38e   :  { %1376 = vmatpush.bf16.msrb.mxu2 %v1975_v9  ;;  %1393 = vmatpush.bf16.msrb.mxu3 %v1978_v13  ;;  %v1034_v9 = vmul.f32 %v2417_v8, %v1032_v4  ;;  %v2423_v13 = vld [vmem:[%s2494_s1 + $0x1] ss:$0 sm:$0xff] }
 0x391   :  { %1307 = vmatpush.bf16.msrb.mxu0 %v1982_v17  ;;  %1342 = vmatpush.bf16.msrb.mxu1 %v1984_v18  ;;  %v1069_v17 = vmul.f32 %v2423_v13, %v1032_v4  ;;  %v2429_v18 = vld [vmem:[%s2495_s2] ss:$0 sm:$0xff] }
 0x392   :  { %1377 = vmatpush.bf16.msrb.mxu2 %v1987_v22  ;;  %1394 = vmatpush.bf16.msrb.mxu3 %v1989_v26  ;;  %v1035_v22 = vadd.f32 %v2429_v18, %v1034_v9  ;;  %v2435_v26 = vld [vmem:[%s2495_s2 + $0x1] ss:$0 sm:$0xff] }
 0x395   :  { %1308 = vmatpush.bf16.msrb.mxu0 %v1992_v30  ;;  %1343 = vmatpush.bf16.msrb.mxu1 %v1996_v34  ;;  %v1070_v30 = vadd.f32 %v2435_v26, %v1069_v17 }
 0x396   :  { %1378 = vmatpush.bf16.msrb.mxu2 %v1998_v35  ;;  %1395 = vmatpush.bf16.msrb.mxu3 %v2001_v39 }
 0x399   :  { %1309 = vmatpush.bf16.msrb.mxu0 %v2004_v45  ;;  %1344 = vmatpush.bf16.msrb.mxu1 %v2008_v46  ;;  %v2441_v46 = vld [vmem:[%s2494_s1 + $0x3] ss:$0 sm:$0xff] }
 0x39a   :  { %1379 = vmatpush.bf16.msrb.mxu2 %v2010_v47  ;;  %1396 = vmatpush.bf16.msrb.mxu3 %v2013_v51  ;;  %v1121_v47 = vmul.f32 %v2441_v46, %v1032_v4 }
 0x39d   :  { %1310 = vmatpush.bf16.msrb.mxu0 %v2016_v57  ;;  %1345 = vmatpush.bf16.msrb.mxu1 %v2020_v59  ;;  %v2447_v59 = vld [vmem:[%s2495_s2 + $0x3] ss:$0 sm:$0xff] }
 0x39e   :  { %1380 = vmatpush.bf16.msrb.mxu2 %v2022_v60  ;;  %1397 = vmatpush.bf16.msrb.mxu3 %v2028_v0  ;;  %v1122_v60 = vadd.f32 %v2447_v59, %v1121_v47 }
 0x3a1   :  { %1311 = vmatpush.bf16.msrb.mxu0 %v2031_v7  ;;  %1346 = vmatpush.bf16.msrb.mxu1 %v2035_v12 }
 0x3a2   :  { %1381 = vmatpush.bf16.msrb.mxu2 %v2037_v14  ;;  %1398 = vmatpush.bf16.msrb.mxu3 %v2040_v20 }
 0x3a5   :  { %1312 = vmatpush.bf16.msrb.mxu0 %v2046_v29  ;;  %1347 = vmatpush.bf16.msrb.mxu1 %v2050_v33 }
 0x3a6   :  { %1382 = vmatpush.bf16.msrb.mxu2 %v2052_v36  ;;  %1399 = vmatpush.bf16.msrb.mxu3 %v2055_v37 }
 0x3a9   :  { %1313 = vmatpush.bf16.msrb.mxu0 %v2058_v43  ;;  %1348 = vmatpush.bf16.msrb.mxu1 %v2062_v44  ;;  %v2453_v44 = vld [vmem:[%s2494_s1 + $0x2] ss:$0 sm:$0xff] }
 0x3aa   :  { %1383 = vmatpush.bf16.msrb.mxu2 %v2064_v48  ;;  %1400 = vmatpush.bf16.msrb.mxu3 %v2067_v49  ;;  %v1104_v48 = vmul.f32 %v2453_v44, %v1032_v4 }
 0x3ac   :  { %v1105_v25 = vadd.f32 %v2459_v15, %v1104_v48 }
 0x408   :  { %v1045_v34 = vpop.f32.mrf.mxu0  ;;  %v1080_v35 = vpop.f32.mrf.mxu1 }
 0x409   :  { %v1049_v39 = vadd.f32 %v1045_v34, %v1035_v22  ;;  %v1084_v45 = vadd.f32 %v1080_v35, %v1070_v30 }
 0x40b   :  { %v1643_v51 = vmul.f32 -1.442695, %v1049_v39  ;;  %v1644_v57 = vmul.f32 -1.442695, %v1084_v45 }
 0x40d   :  { %1787 = vpow2.f32 %v1643_v51 }
 0x40e   :  { %1789 = vpow2.f32 %v1644_v57 }
 0x40f   :  { %v1115_v0 = vpop.f32.mrf.mxu2  ;;  %v1132_v7 = vpop.f32.mrf.mxu3 }
 0x410   :  { %v1136_v12 = vadd.f32 %v1132_v7, %v1122_v60  ;;  %v1047_v14 = vpop.f32.mrf.mxu0  ;;  %v1082_v20 = vpop.f32.mrf.mxu1  ;;  %v1119_v52 = vadd.f32 %v1115_v0, %v1105_v25 }
 0x412   :  { %v1645_v29 = vmul.f32 -1.442695, %v1136_v12 }
 0x413   :  { %v1788_v33 = vpop.eup %1787 }
 0x414   :  { %v1790_v36 = vpop.eup %1789  ;;  %v1053_v37 = vadd.f32 1.0, %v1788_v33  ;;  %1791 = vpow2.f32 %v1645_v29 }
 0x415   :  { %v1088_v43 = vadd.f32 1.0, %v1790_v36 }
 0x416   :  { %1793 = vrcp.f32 %v1053_v37  ;;  %v1065_v58 = vand.u32 2147483648, %v1053_v37  ;;  %v1063_v27 = vand.u32 2147483647, %v1053_v37  ;;  %vm1059_vm14 = vweird.f32 %v1053_v37 }
 0x417   :  { %1795 = vrcp.f32 %v1088_v43  ;;  %v1117_v49 = vpop.f32.mrf.mxu2  ;;  %v1134_v1 = vpop.f32.mrf.mxu3  ;;  %v1100_v11 = vand.u32 2147483648, %v1088_v43  ;;  %v1098_v6 = vand.u32 2147483647, %v1088_v43  ;;  %vm1094_vm15 = vweird.f32 %v1088_v43 }
 0x418   :  { %v1066_v42 = vor.u32 1.1754944e-38, %v1065_v58  ;;  %vm1064_vm2 = vcmp.eq.f32.partialorder %v1063_v27, 8.507059e+37 }
 0x419   :  { %v1101_v23 = vor.u32 1.1754944e-38, %v1100_v11  ;;  %vm1099_vm3 = vcmp.eq.f32.partialorder %v1098_v6, 8.507059e+37 }
 0x41a   :  { %v1792_v32 = vpop.eup %1791 }
 0x41b   :  { %v1140_v19 = vadd.f32 1.0, %v1792_v32 }
 0x41c   :  { %v1794_v55 = vpop.eup %1793 }
 0x41d   :  { %v1796_v53 = vpop.eup %1795  ;;  %v1055_v3 = vmul.f32 %v1794_v55, %v1053_v37  ;;  %1797 = vrcp.f32 %v1140_v19  ;;  %vm1060_vm12 = vweird.f32 %v1794_v55  ;;  %v1152_v30 = vand.u32 2147483648, %v1140_v19 }
 0x41e   :  { %v1090_v38 = vmul.f32 %v1796_v53, %v1088_v43  ;;  %1799 = vtanh.f32 %v1119_v52  ;;  %vm1095_vm13 = vweird.f32 %v1796_v53  ;;  %vm1061_vm0 = vmor %vm1059_vm14, %vm1060_vm12  ;;  %vm1146_vm5 = vweird.f32 %v1140_v19 }
 0x41f   :  { %v1056_v54 = vsub.f32 1.0, %v1055_v3  ;;  %vm1096_vm1 = vmor %vm1094_vm15, %vm1095_vm13  ;;  %v1150_v34 = vand.u32 2147483647, %v1140_v19  ;;  %v1153_v39 = vor.u32 1.1754944e-38, %v1152_v30 }
 0x420   :  { %v1091_v56 = vsub.f32 1.0, %v1090_v38 }
 0x421   :  { %v1057_v62 = vmul.f32 %v1794_v55, %v1056_v54  ;;  %vm1151_vm7 = vcmp.eq.f32.partialorder %v1150_v34, 8.507059e+37 }
 0x422   :  { %v1092_v2 = vmul.f32 %v1796_v53, %v1091_v56 }
 0x423   :  { %v1798_v63 = vpop.eup %1797  ;;  %v1058_v31 = vadd.f32 %v1794_v55, %v1057_v62 }
 0x424   :  { %v1093_v16 = vadd.f32 %v1796_v53, %v1092_v2  ;;  %v1142_v5 = vmul.f32 %v1798_v63, %v1140_v19  ;;  %v1800_v21 = vpop.eup %1799  ;;  %vm1147_vm4 = vweird.f32 %v1798_v63 }
 0x425   :  { %v1062_v24 = vsel %vm1061_vm0, %v1794_v55, %v1058_v31  ;;  %vm1148_vm6 = vmor %vm1146_vm5, %vm1147_vm4 }
 0x426   :  { %v1067_v40 = vsel %vm1064_vm2, %v1066_v42, %v1062_v24  ;;  %v1097_v61 = vsel %vm1096_vm1, %v1796_v53, %v1093_v16  ;;  %v1143_v50 = vsub.f32 1.0, %v1142_v5 }
 0x427   :  { %v1102_v10 = vsel %vm1099_vm3, %v1101_v23, %v1097_v61  ;;  %v1157_v41 = vmul.f32 %v1800_v21, %v1067_v40 }
 0x428   :  { %v1156_v4 = vmul.f32 %v1102_v10, %v2379_v28  ;;  %v1144_v9 = vmul.f32 %v1798_v63, %v1143_v50  ;;  %v1167_v28 = vpop.permute.xlu0 %1166 }
 0x429   :  { %v1169_v60 = vmul.f32 %v2417_v8, %v1167_v28  ;;  %v1204_v0 = vmul.f32 %v2423_v13, %v1167_v28  ;;  %v1256_v36 = vmul.f32 %v2441_v46, %v1167_v28  ;;  %v1239_v54 = vmul.f32 %v2453_v44, %v1167_v28 }
 0x42a   :  { %v2463_v17 = vadd.f32 %v1157_v41, %v1156_v4  ;;  %v1145_v22 = vadd.f32 %v1798_v63, %v1144_v9 }
 0x42b   :  { %v1170_v7 = vadd.f32 %v2429_v18, %v1169_v60  ;;  %v1205_v12 = vadd.f32 %v2435_v26, %v1204_v0  ;;  %v1257_v48 = vadd.f32 %v2447_v59, %v1256_v36  ;;  %v1240_v62 = vadd.f32 %v2459_v15, %v1239_v54 }
 0x42c   :  { %1801 = vtanh.f32 %v2463_v17  ;;  %v1149_v35 = vsel %vm1148_vm6, %v1798_v63, %v1145_v22 }
 0x42d   :  { %v1154_v47 = vsel %vm1151_vm7, %v1153_v39, %v1149_v35 }
 0x432   :  { %v1802_v45 = vpop.eup %1801 }
 0x433   :  { %v1160_v51 = vmul.f32 %v1802_v45, %v1154_v47 }
 0x435   :  { %v1163_v57 = vpack.c.bf16 %v1160_v51, %v1160_v51 }
 0x437   :  { %1179 = vmatmul.bf16.vlgmr.msra.gmra.mxu0 %v1163_v57  ;;  %1214 = vmatmul.bf16.vlgmr.msra.gmra.mxu1 %v1163_v57 }
 0x438   :  { %1249 = vmatmul.bf16.vlgmr.msra.gmra.mxu2 %v1163_v57  ;;  %1266 = vmatmul.bf16.vlgmr.msra.gmra.mxu3 %v1163_v57 }
 0x4b4   :  { %v1180_v14 = vpop.f32.mrf.mxu0  ;;  %v1215_v20 = vpop.f32.mrf.mxu1 }
 0x4b5   :  { %v1184_v29 = vadd.f32 %v1180_v14, %v1170_v7  ;;  %v1219_v33 = vadd.f32 %v1215_v20, %v1205_v12 }
 0x4b7   :  { %v1647_v37 = vmul.f32 -1.442695, %v1184_v29  ;;  %v1648_v43 = vmul.f32 -1.442695, %v1219_v33 }
 0x4b9   :  { %1803 = vpow2.f32 %v1647_v37 }
 0x4ba   :  { %1805 = vpow2.f32 %v1648_v43 }
 0x4bb   :  { %v1250_v49 = vpop.f32.mrf.mxu2  ;;  %v1267_v1 = vpop.f32.mrf.mxu3 }
 0x4bc   :  { %v1271_v32 = vadd.f32 %v1267_v1, %v1257_v48  ;;  %v1182_v25 = vpop.f32.mrf.mxu0  ;;  %v1217_v19 = vpop.f32.mrf.mxu1  ;;  %v1254_v6 = vadd.f32 %v1250_v49, %v1240_v62  ;;  %v1450_v48 = vld [vmem:[#allocation7 + $0x70] sm:$0xff]  ;;  %v1449_v49 = vld [vmem:[#allocation7 + $0x68] sm:$0xff]  ;;  %v1448_v1 = vld [vmem:[#allocation7 + $0x60] sm:$0xff] }
 0x4bd   :  { %v1446_v25 = vld [vmem:[#allocation7 + $0x50] sm:$0xff]  ;;  %v1302_v19 = vpop.permute.xlu1 %1301 }
 0x4be   :  { %v1649_v55 = vmul.f32 -1.442695, %v1271_v32  ;;  %v1447_v32 = vld [vmem:[#allocation7 + $0x58] sm:$0xff] }
 0x4bf   :  { %v1804_v52 = vpop.eup %1803 }
 0x4c0   :  { %v1806_v53 = vpop.eup %1805  ;;  %v1188_v3 = vadd.f32 1.0, %v1804_v52  ;;  %1807 = vpow2.f32 %v1649_v55  ;;  %v1445_v55 = vld [vmem:[#allocation7 + $0x48] sm:$0xff]  ;;  %v1304_v52 = vmul.f32 %v2417_v8, %v1302_v19 }
 0x4c1   :  { %v1223_v38 = vadd.f32 1.0, %v1806_v53  ;;  %v1339_v53 = vmul.f32 %v2423_v13, %v1302_v19 }
 0x4c2   :  { %1809 = vrcp.f32 %v1188_v3  ;;  %v1200_v23 = vand.u32 2147483648, %v1188_v3  ;;  %v1198_v40 = vand.u32 2147483647, %v1188_v3  ;;  %vm1194_vm10 = vweird.f32 %v1188_v3 }
 0x4c3   :  { %1811 = vrcp.f32 %v1223_v38  ;;  %v1252_v56 = vpop.f32.mrf.mxu2  ;;  %v1269_v58 = vpop.f32.mrf.mxu3  ;;  %v1235_v24 = vand.u32 2147483648, %v1223_v38  ;;  %v1233_v50 = vand.u32 2147483647, %v1223_v38  ;;  %vm1229_vm11 = vweird.f32 %v1223_v38 }
 0x4c4   :  { %v1201_v4 = vor.u32 1.1754944e-38, %v1200_v23  ;;  %vm1199_vm14 = vcmp.eq.f32.partialorder %v1198_v40, 8.507059e+37  ;;  %v1305_v54 = vadd.f32 %v2429_v18, %v1304_v52  ;;  %v1340_v56 = vadd.f32 %v2435_v26, %v1339_v53  ;;  %v1442_v58 = vld [vmem:[#allocation7 + $0x30] sm:$0xff]  ;;  %v1437_v23 = vld [vmem:[#allocation7 + $0x8] sm:$0xff] }
 0x4c5   :  { %v1236_v30 = vor.u32 1.1754944e-38, %v1235_v24  ;;  %vm1234_vm15 = vcmp.eq.f32.partialorder %v1233_v50, 8.507059e+37 }
 0x4c6   :  { %v1808_v11 = vpop.eup %1807 }
 0x4c7   :  { %v1275_v27 = vadd.f32 1.0, %v1808_v11 }
 0x4c8   :  { %v1810_v2 = vpop.eup %1809 }
 0x4c9   :  { %v1812_v63 = vpop.eup %1811  ;;  %v1190_v31 = vmul.f32 %v1810_v2, %v1188_v3  ;;  %1813 = vrcp.f32 %v1275_v27  ;;  %vm1195_vm8 = vweird.f32 %v1810_v2  ;;  %v1287_v12 = vand.u32 2147483648, %v1275_v27  ;;  %v1444_v3 = vld [vmem:[#allocation7 + $0x40] sm:$0xff] }
 0x4ca   :  { %v1225_v42 = vmul.f32 %v1812_v63, %v1223_v38  ;;  %1815 = vtanh.f32 %v1254_v6  ;;  %vm1230_vm9 = vweird.f32 %v1812_v63  ;;  %vm1196_vm12 = vmor %vm1194_vm10, %vm1195_vm8  ;;  %vm1281_vm1 = vweird.f32 %v1275_v27  ;;  %v1443_v38 = vld [vmem:[#allocation7 + $0x38] sm:$0xff]  ;;  %v1441_v6 = vld [vmem:[#allocation7 + $0x28] sm:$0xff] }
 0x4cb   :  { %v1191_v16 = vsub.f32 1.0, %v1190_v31  ;;  %vm1231_vm13 = vmor %vm1229_vm11, %vm1230_vm9  ;;  %v1285_v14 = vand.u32 2147483647, %v1275_v27  ;;  %v1288_v29 = vor.u32 1.1754944e-38, %v1287_v12  ;;  %v1440_v31 = vld [vmem:[#allocation7 + $0x20] sm:$0xff] }
 0x4cc   :  { %v1226_v5 = vsub.f32 1.0, %v1225_v42  ;;  %v1439_v42 = vld [vmem:[#allocation7 + $0x18] sm:$0xff] }
 0x4cd   :  { %v1192_v21 = vmul.f32 %v1810_v2, %v1191_v16  ;;  %vm1286_vm3 = vcmp.eq.f32.partialorder %v1285_v14, 8.507059e+37  ;;  %v1438_v16 = vld [vmem:[#allocation7 + $0x10] sm:$0xff] }
 0x4ce   :  { %v1227_v61 = vmul.f32 %v1812_v63, %v1226_v5 }
 0x4cf   :  { %v1814_v10 = vpop.eup %1813  ;;  %v1193_v41 = vadd.f32 %v1810_v2, %v1192_v21 }
 0x4d0   :  { %v1228_v9 = vadd.f32 %v1812_v63, %v1227_v61  ;;  %v1277_v22 = vmul.f32 %v1814_v10, %v1275_v27  ;;  %v1816_v35 = vpop.eup %1815  ;;  %vm1282_vm0 = vweird.f32 %v1814_v10 }
 0x4d1   :  { %v1197_v34 = vsel %vm1196_vm12, %v1810_v2, %v1193_v41  ;;  %vm1283_vm2 = vmor %vm1281_vm1, %vm1282_vm0 }
 0x4d2   :  { %v1202_v39 = vsel %vm1199_vm14, %v1201_v4, %v1197_v34  ;;  %v1232_v45 = vsel %vm1231_vm13, %v1812_v63, %v1228_v9  ;;  %v1278_v47 = vsub.f32 1.0, %v1277_v22  ;;  %v1391_v63 = vmul.f32 %v2441_v46, %v1302_v19  ;;  %v1436_v46 = vld [vmem:[#allocation7] sm:$0xff] }
 0x4d3   :  { %v1237_v51 = vsel %vm1234_vm15, %v1236_v30, %v1232_v45  ;;  %v1292_v57 = vmul.f32 %v1816_v35, %v1202_v39  ;;  %v1374_v9 = vmul.f32 %v2453_v44, %v1302_v19 }
 0x4d4   :  { %v1291_v28 = vmul.f32 %v1237_v51, %v2463_v17  ;;  %v1279_v60 = vmul.f32 %v1814_v10, %v1278_v47  ;;  %v1451_v17 = vld [vmem:[#allocation7 + $0x78] sm:$0xff]  ;;  %v1392_v18 = vadd.f32 %v2447_v59, %v1391_v63 }
 0x4d5   :  { %1456 = vmatpush.msra.mxu0 %v1451_v17  ;;  %v1375_v34 = vadd.f32 %v2459_v15, %v1374_v9 }
 0x4d6   :  { %v2475_v0 = vadd.f32 %v1292_v57, %v1291_v28  ;;  %v1280_v7 = vadd.f32 %v1814_v10, %v1279_v60 }
 0x4d7   :  { %1457 = vmatpush.msra.mxu0 %v1450_v48 }
 0x4d8   :  { %1817 = vtanh.f32 %v2475_v0  ;;  %v1284_v20 = vsel %vm1283_vm2, %v1814_v10, %v1280_v7 }
 0x4d9   :  { %v1289_v36 = vsel %vm1286_vm3, %v1288_v29, %v1284_v20  ;;  %1458 = vmatpush.msra.mxu0 %v1449_v49 }
 0x4db   :  { %1459 = vmatpush.msra.mxu0 %v1448_v1 }
 0x4dd   :  { %1460 = vmatpush.msra.mxu0 %v1447_v32 }
 0x4de   :  { %v1818_v33 = vpop.eup %1817 }
 0x4df   :  { %v1295_v37 = vmul.f32 %v1818_v33, %v1289_v36  ;;  %1461 = vmatpush.msra.mxu0 %v1446_v25 }
 0x4e1   :  { %v1298_v43 = vpack.c.bf16 %v1295_v37, %v1295_v37  ;;  %1462 = vmatpush.msra.mxu0 %v1445_v55 }
 0x4e3   :  { %1314 = vmatmul.bf16.vlgmr.msrb.gmra.mxu0 %v1298_v43  ;;  %1349 = vmatmul.bf16.vlgmr.msrb.gmra.mxu1 %v1298_v43 }
 0x4e4   :  { %1384 = vmatmul.bf16.vlgmr.msrb.gmra.mxu2 %v1298_v43  ;;  %1401 = vmatmul.bf16.vlgmr.msrb.gmra.mxu3 %v1298_v43 }
 0x4e5   :  { %1463 = vmatpush.msra.mxu0 %v1444_v3 }
 0x4e7   :  { %1464 = vmatpush.msra.mxu0 %v1443_v38 }
 0x4e9   :  { %1465 = vmatpush.msra.mxu0 %v1442_v58 }
 0x4eb   :  { %1466 = vmatpush.msra.mxu0 %v1441_v6 }
 0x4ed   :  { %1467 = vmatpush.msra.mxu0 %v1440_v31 }
 0x4ef   :  { %1468 = vmatpush.msra.mxu0 %v1439_v42 }
 0x4f1   :  { %1469 = vmatpush.msra.mxu0 %v1438_v16 }
 0x4f3   :  { %1470 = vmatpush.msra.mxu0 %v1437_v23 }
 0x4f5   :  { %1471 = vmatpush.msra.mxu0 %v1436_v46 }
 0x560   :  { %v1315_v11 = vpop.f32.mrf.mxu0  ;;  %v1350_v62 = vpop.f32.mrf.mxu1 }
 0x561   :  { %v1319_v27 = vadd.f32 %v1315_v11, %v1305_v54  ;;  %v1354_v2 = vadd.f32 %v1350_v62, %v1340_v56 }
 0x563   :  { %v1651_v8 = vmul.f32 -1.442695, %v1319_v27  ;;  %v1652_v13 = vmul.f32 -1.442695, %v1354_v2 }
 0x565   :  { %1819 = vpow2.f32 %v1651_v8 }
 0x566   :  { %1821 = vpow2.f32 %v1652_v13 }
 0x567   :  { %v1385_v26 = vpop.f32.mrf.mxu2  ;;  %v1402_v5 = vpop.f32.mrf.mxu3 }
 0x568   :  { %v1406_v24 = vadd.f32 %v1402_v5, %v1392_v18  ;;  %v1317_v21 = vpop.f32.mrf.mxu0  ;;  %v1352_v40 = vpop.f32.mrf.mxu1  ;;  %v1389_v45 = vadd.f32 %v1385_v26, %v1375_v34 }
 0x56a   :  { %v1653_v61 = vmul.f32 -1.442695, %v1406_v24 }
 0x56b   :  { %v1820_v50 = vpop.eup %1819 }
 0x56c   :  { %v1822_v10 = vpop.eup %1821  ;;  %v1323_v41 = vadd.f32 1.0, %v1820_v50  ;;  %1823 = vpow2.f32 %v1653_v61 }
 0x56d   :  { %v1358_v4 = vadd.f32 1.0, %v1822_v10 }
 0x56e   :  { %1825 = vrcp.f32 %v1323_v41  ;;  %v1335_v7 = vand.u32 2147483648, %v1323_v41  ;;  %v1333_v14 = vand.u32 2147483647, %v1323_v41  ;;  %vm1329_vm6 = vweird.f32 %v1323_v41 }
 0x56f   :  { %1827 = vrcp.f32 %v1358_v4  ;;  %v1387_v59 = vpop.f32.mrf.mxu2  ;;  %v1404_v22 = vpop.f32.mrf.mxu3  ;;  %v1370_v12 = vand.u32 2147483648, %v1358_v4  ;;  %v1368_v29 = vand.u32 2147483647, %v1358_v4  ;;  %vm1364_vm7 = vweird.f32 %v1358_v4 }
 0x570   :  { %v1336_v36 = vor.u32 1.1754944e-38, %v1335_v7  ;;  %vm1334_vm10 = vcmp.eq.f32.partialorder %v1333_v14, 8.507059e+37 }
 0x571   :  { %v1371_v17 = vor.u32 1.1754944e-38, %v1370_v12  ;;  %vm1369_vm11 = vcmp.eq.f32.partialorder %v1368_v29, 8.507059e+37 }
 0x572   :  { %v1824_v30 = vpop.eup %1823 }
 0x573   :  { %v1410_v35 = vadd.f32 1.0, %v1824_v30 }
 0x574   :  { %v1826_v39 = vpop.eup %1825 }
 0x575   :  { %v1828_v47 = vpop.eup %1827  ;;  %v1325_v51 = vmul.f32 %v1826_v39, %v1323_v41  ;;  %1829 = vrcp.f32 %v1410_v35  ;;  %vm1330_vm4 = vweird.f32 %v1826_v39  ;;  %v1422_v54 = vand.u32 2147483648, %v1410_v35 }
 0x576   :  { %v1360_v57 = vmul.f32 %v1828_v47, %v1358_v4  ;;  %1831 = vtanh.f32 %v1389_v45  ;;  %vm1365_vm5 = vweird.f32 %v1828_v47  ;;  %vm1331_vm8 = vmor %vm1329_vm6, %vm1330_vm4  ;;  %vm1416_vm13 = vweird.f32 %v1410_v35 }
 0x577   :  { %v1326_v28 = vsub.f32 1.0, %v1325_v51  ;;  %vm1366_vm9 = vmor %vm1364_vm7, %vm1365_vm5  ;;  %v1420_v56 = vand.u32 2147483647, %v1410_v35  ;;  %v1423_v11 = vor.u32 1.1754944e-38, %v1422_v54 }
 0x578   :  { %v1361_v60 = vsub.f32 1.0, %v1360_v57 }
 0x579   :  { %v1327_v44 = vmul.f32 %v1826_v39, %v1326_v28  ;;  %vm1421_vm15 = vcmp.eq.f32.partialorder %v1420_v56, 8.507059e+37 }
 0x57a   :  { %v1362_v20 = vmul.f32 %v1828_v47, %v1361_v60 }
 0x57b   :  { %v1830_v33 = vpop.eup %1829  ;;  %v1328_v15 = vadd.f32 %v1826_v39, %v1327_v44 }
 0x57c   :  { %v1363_v37 = vadd.f32 %v1828_v47, %v1362_v20  ;;  %v1412_v43 = vmul.f32 %v1830_v33, %v1410_v35  ;;  %v1832_v49 = vpop.eup %1831  ;;  %vm1417_vm12 = vweird.f32 %v1830_v33 }
 0x57d   :  { %v1332_v48 = vsel %vm1331_vm8, %v1826_v39, %v1328_v15  ;;  %vm1418_vm14 = vmor %vm1416_vm13, %vm1417_vm12 }
 0x57e   :  { %v1337_v1 = vsel %vm1334_vm10, %v1336_v36, %v1332_v48  ;;  %v1367_v32 = vsel %vm1366_vm9, %v1828_v47, %v1363_v37  ;;  %v1413_v25 = vsub.f32 1.0, %v1412_v43 }
 0x57f   :  { %v1372_v19 = vsel %vm1369_vm11, %v1371_v17, %v1367_v32  ;;  %v1427_v55 = vmul.f32 %v1832_v49, %v1337_v1 }
 0x580   :  { %v1426_v52 = vmul.f32 %v1372_v19, %v2475_v0  ;;  %v1414_v53 = vmul.f32 %v1830_v33, %v1413_v25  ;;  %v1706_v0 = vld [vmem:[%s2498_s5] ss:$0 sm:$0xff] }
 0x582   :  { %v1428_v3 = vadd.f32 %v1427_v55, %v1426_v52  ;;  %v1415_v38 = vadd.f32 %v1830_v33, %v1414_v53 }
 0x584   :  { %1833 = vtanh.f32 %v1428_v3  ;;  %v1419_v58 = vsel %vm1418_vm14, %v1830_v33, %v1415_v38 }
 0x585   :  { %v1424_v27 = vsel %vm1421_vm15, %v1423_v11, %v1419_v58 }
 0x58a   :  { %v1834_v62 = vpop.eup %1833 }
 0x58b   :  { %v1430_v2 = vmul.f32 %v1834_v62, %v1424_v27 }
 0x58d   :  { %1472 = vmatmul.f32.vlgmr.msra.gmra.mxu0 %v1430_v2 }
 0x60a   :  { %v1473_v6 = vpop.f32.mrf.mxu0 }
 0x60b   :  { %v1474_v63 = vadd.f32 %v1706_v0, %v1473_v6 }
 0x60d   :  { %1476 = vst [vmem:[#allocation9] sm:$0xff] %v1474_v63 }
 0x60e   :  { %1487 = dma.vmem_to_hbm [thread:$0]  %s1483_s7, 128, %s1485_s10, [#allocation6]  }
 0x60f   :  { %1919 = dma.done.wait [#allocation6], 128  }
 0x610   :  { %1920 = vsyncadd [#allocation6], 4294967168 }
 0x611   :  { %1492 = vsyncpa [#allocation5], 1 }
 0x612   :  { %1493 = vsyncpa [#allocation8], 1 }
 0x613   :  { %1494 = vsyncpa [#allocation6], 1 }

</bundles_post_ra>
